<compile_context>
chip_gen: v7x
topology: tpu7x:2x2x1
jax: 0.10.0
libtpu: 0.0.40
codegen_flags: <defaults>
</compile_context>

<pallas_src>
import functools
import math

import numpy as np
import jax
import jax.numpy as jnp
from jax.experimental import pallas as pl
from jax.experimental.pallas import tpu as pltpu


# ----------------------------- Pallas kernel ---------------------------------
def _kan_conv_kernel(base_w_ref, spline_w_ref, x_ref, o_ref, *,
                     knots, spline_order, k_feat):
    """Apply the (out_features=1) KANLinear to an 8-sublane-packed patch tile.

    base_w_ref  : VMEM (2K, 1)     base_weight duplicated over both packed halves
    spline_w_ref: VMEM (2K, C)     scaled spline weight * 1/(S*h), duplicated
    x_ref       : VMEM (2K, TN)    two half-ranges of patches stacked on sublanes
    o_ref       : VMEM (2, TN)     per-patch scalar output, one row per half
    knots       : tuple of Python floats (trace-time f32 constants), len G+2S+1
    spline_order: S (>= 1)
    k_feat      : K = prod(kernel_size)
    """
    n_coef = spline_w_ref.shape[1]
    n_knots = len(knots)
    S = spline_order

    x = x_ref[...].astype(jnp.float32)          # (2K, TN)
    bw = base_w_ref[...]                        # (2K, 1)   hoisted load
    sw = spline_w_ref[...]                      # (2K, C)   hoisted load

    # ---- base path: SiLU(x) * base_weight (sublane-broadcast FMAs) ----
    acc = bw * (x * jax.nn.sigmoid(x))          # (2K, TN)

    # ---- order-0 indicators: [t_j, t_{j+1}) == ge[j] - ge[j+1] (monotone knots)
    ge = [(x >= knots[j]).astype(jnp.float32) for j in range(n_knots)]
    bases = [ge[j] - ge[j + 1] for j in range(n_knots - 1)]

    # ---- knot differences, shared across all recursion levels ----
    d = [x - knots[j] for j in range(n_knots)]

    # ---- Cox-de Boor on a uniform grid: level-k denominators are all k*h ----
    for k in range(1, S):
        inv_kh = 1.0 / (knots[k] - knots[0])    # == 1/(k*h), from the f32 knots
        bases = [
            (d[j] * bases[j] - d[j + k + 1] * bases[j + 1]) * inv_kh
            for j in range(len(bases) - 1)
        ]

    # ---- final level (k == S) fused with the coefficient sum.
    # 1/(S*h) is already folded into `sw`, so each coefficient costs
    # 2 mul + 1 sub + 1 FMA and no final-basis temporaries are materialized.
    for j in range(n_coef):
        acc = acc + sw[:, j:j + 1] * (d[j] * bases[j] - d[j + S + 1] * bases[j + 1])

    # ---- grouped sublane reduce: (2K, TN) -> (2, TN), lane-dense output ----
    top = jnp.sum(acc[:k_feat, :], axis=0, keepdims=True)
    bot = jnp.sum(acc[k_feat:, :], axis=0, keepdims=True)
    o_ref[...] = jnp.concatenate([top, bot], axis=0).astype(o_ref.dtype)


# ------------------------------- wrapper --------------------------------------
def kan_conv2d(
    x,
    base_w,
    spline_w_scaled,
    *,
    kernel_size=(2, 2),
    stride=(1, 1),
    dilation=(1, 1),
    padding=(0, 0),
    grid_size=5,
    spline_order=3,
    grid_range=(-1.0, 1.0),
    tile_n=None,
):
    """KAN convolution forward. x: (B, C, H, W) float32 (NCHW)."""
    B, C, H, W = x.shape
    kh, kw = kernel_size
    K = kh * kw
    n_coef = grid_size + spline_order
    assert spline_order >= 1
    assert base_w.shape == (K,)
    assert spline_w_scaled.shape == (K, n_coef)

    # Uniform knot grid — identical for every input feature in KANLinear's init.
    # Built in f32 exactly like the reference buffer, then baked as trace-time
    # Python constants (so indicator boundaries match the f32 reference bit-for-bit).
    h = (grid_range[1] - grid_range[0]) / grid_size
    knots_np = (
        np.arange(-spline_order, grid_size + spline_order + 1, dtype=np.float32)
        * np.float32(h)
        + np.float32(grid_range[0])
    )
    knots = tuple(float(v) for v in knots_np)

    # ---- pad + unfold (torch.nn.Unfold ordering), directly in (K, N) layout ----
    x_p = jnp.pad(
        x, ((0, 0), (0, 0), (padding[0], padding[0]), (padding[1], padding[1]))
    )
    Hp, Wp = H + 2 * padding[0], W + 2 * padding[1]
    H_out = (Hp - dilation[0] * (kh - 1) - 1) // stride[0] + 1
    W_out = (Wp - dilation[1] * (kw - 1) - 1) // stride[1] + 1
    N = B * C * H_out * W_out

    rows = []
    for a in range(kh):
        for b in range(kw):
            sl = x_p[
                :, :,
                a * dilation[0]: a * dilation[0] + (H_out - 1) * stride[0] + 1: stride[0],
                b * dilation[1]: b * dilation[1] + (W_out - 1) * stride[1] + 1: stride[1],
            ]
            rows.append(sl.reshape(-1))
    patches_kn = jnp.stack(rows, axis=0)  # (K, N) — lane-dense over patches

    # ---- tile / grid sizing: modest lane tiles (vreg pressure > step overhead),
    # even step count >= 2 so v7x's two TensorCores both get work. ----
    N_half = -(-N // 2)
    if tile_n is None:
        tile_n = min(1024, max(256, ((-(-N_half // 2) + 127) // 128) * 128))
    tile_n = ((tile_n + 127) // 128) * 128
    steps = -(-N_half // tile_n)
    steps = max(2, steps + (steps % 2))
    N_half_pad = steps * tile_n

    # Pad with an in-range value strictly inside a knot cell so padded lanes
    # never hit a knot boundary / produce non-finite (results sliced off anyway).
    pad_val = grid_range[0] + 0.5 * h
    patches = jnp.pad(
        patches_kn, ((0, 0), (0, 2 * N_half_pad - N)), constant_values=pad_val
    )
    # 8-sublane packing: two halves of the patch range stacked on sublanes.
    patches_2k = jnp.concatenate(
        [patches[:, :N_half_pad], patches[:, N_half_pad:]], axis=0
    )  # (2K, N_half_pad)

    # Duplicate weights across both packed halves; fold the final-level 1/(S*h).
    inv_Sh = np.float32(1.0) / np.float32(knots[spline_order] - knots[0])
    base_w2 = jnp.tile(base_w.reshape(K, 1), (2, 1))              # (2K, 1)
    spline_w2 = jnp.tile(spline_w_scaled * inv_Sh, (2, 1))        # (2K, n_coef)

    kernel = functools.partial(
        _kan_conv_kernel, knots=knots, spline_order=spline_order, k_feat=K
    )

    out2 = pl.pallas_call(
        kernel,
        out_shape=jax.ShapeDtypeStruct((2, N_half_pad), x.dtype),
        grid=(steps,),
        in_specs=[
            pl.BlockSpec((2 * K, 1), lambda n: (0, 0)),           # base_w (dup)
            pl.BlockSpec((2 * K, n_coef), lambda n: (0, 0)),      # spline_w (dup)
            pl.BlockSpec((2 * K, tile_n), lambda n: (0, n)),      # packed patch tile
        ],
        out_specs=pl.BlockSpec((2, tile_n), lambda n: (0, n)),
        compiler_params=pltpu.CompilerParams(dimension_semantics=("parallel",)),
    )(base_w2, spline_w2, patches_2k)

    # Row 0 covers patches [0, N_half_pad), row 1 covers [N_half_pad, 2*N_half_pad).
    return out2.reshape(-1)[:N].reshape(B, C, H_out, W_out)


# --------------------------- pure-JAX reference --------------------------------
def _kan_linear_ref(x_nk, knots, base_w, spline_w, spline_order):
    silu = x_nk * jax.nn.sigmoid(x_nk)
    base_out = silu @ base_w  # (N,)
    xg = x_nk[:, :, None]
    bases = ((xg >= knots[None, :, :-1]) & (xg < knots[None, :, 1:])).astype(x_nk.dtype)
    for k in range(1, spline_order + 1):
        bases = (
            (xg - knots[None, :, : -(k + 1)])
            / (knots[None, :, k:-1] - knots[None, :, : -(k + 1)])
            * bases[:, :, :-1]
        ) + (
            (knots[None, :, k + 1:] - xg)
            / (knots[None, :, k + 1:] - knots[None, :, 1:-k])
            * bases[:, :, 1:]
        )
    spline_out = jnp.einsum("nkc,kc->n", bases, spline_w)
    return base_out + spline_out


# ---------------------------------- main ---------------------------------------
if __name__ == "__main__":
    # Module hyperparameters (defaults of KAN_Convolution).
    kernel_size = (2, 2)
    stride = (1, 1)
    padding = (0, 0)
    dilation = (1, 1)
    grid_size = 5
    spline_order = 3
    grid_range = (-1.0, 1.0)

    K = math.prod(kernel_size)                       # in_features = 4
    n_coef = grid_size + spline_order                # 8
    n_knots = grid_size + 2 * spline_order + 1       # 12

    # Deterministic synthetic parameters (shapes from KANLinear.__init__).
    key = jax.random.PRNGKey(0)
    k_bw, k_sw, k_ss, k_x = jax.random.split(key, 4)
    base_weight = jax.random.uniform(k_bw, (1, K), jnp.float32, -0.5, 0.5)
    spline_weight = jax.random.uniform(k_sw, (1, K, n_coef), jnp.float32, -0.5, 0.5)
    spline_scaler = jax.random.uniform(k_ss, (1, K), jnp.float32, -0.5, 0.5)
    # enable_standalone_scale_spline=True path: scaled_spline_weight
    spline_w_scaled = (spline_weight * spline_scaler[..., None])[0]  # (K, n_coef)
    base_w = base_weight[0]                                          # (K,)

    # Knot grid buffer (same construction as KANLinear) — used by the reference.
    h = (grid_range[1] - grid_range[0]) / grid_size
    knots_1d = (
        jnp.arange(-spline_order, grid_size + spline_order + 1, dtype=jnp.float32) * h
        + grid_range[0]
    )
    knots = jnp.broadcast_to(knots_1d, (K, n_knots)).astype(jnp.float32)  # (K, 12)

    # Input (NCHW), small shape.
    B, C, H, W = 2, 4, 16, 16
    x = jax.random.normal(k_x, (B, C, H, W), jnp.float32)

    out = kan_conv2d(
        x, base_w, spline_w_scaled,
        kernel_size=kernel_size, stride=stride, dilation=dilation, padding=padding,
        grid_size=grid_size, spline_order=spline_order, grid_range=grid_range,
    )
    out = jax.block_until_ready(out)

    # Cross-check against a pure-JAX reference of the same math.
    H_out = (H - (kernel_size[0] - 1) - 1) // stride[0] + 1
    W_out = (W - (kernel_size[1] - 1) - 1) // stride[1] + 1
    cols = []
    for a in range(kernel_size[0]):
        for b in range(kernel_size[1]):
            cols.append(x[:, :, a: a + H_out, b: b + W_out])
    patches_ref = jnp.stack(cols, axis=-1).reshape(-1, K)
    ref = _kan_linear_ref(patches_ref, knots, base_w, spline_w_scaled, spline_order)
    ref = ref.reshape(B, C, H_out, W_out)

    assert out.shape == (B, C, H_out, W_out)
    assert jnp.allclose(out, ref, atol=1e-5, rtol=1e-5), float(
        jnp.max(jnp.abs(out - ref))
    )
    print("KERNEL_OK")
</pallas_src>

<mosaic_0001>
module attributes {stable_mosaic.version = 11 : i64} {
  func.func @_kan_conv_kernel(%arg0: i32, %arg1: memref<8x1xf32, #tpu.memory_space<vmem>>, %arg2: memref<8x8xf32, #tpu.memory_space<vmem>>, %arg3: memref<8x512xf32, #tpu.memory_space<vmem>>, %arg4: memref<2x512xf32, #tpu.memory_space<vmem>>) attributes {dimension_semantics = [#tpu.dimension_semantics<parallel>], iteration_bounds = array<i64: 2>, scalar_prefetch = 0 : i64, scratch_operands = 0 : i64, tpu.core_type = #tpu.core_type<tc>, window_params = [{pipeline_mode = #tpu.pipeline_mode<synchronous>, transform_indices = @transform_0, window_bounds = array<i64: 8, 1>}, {pipeline_mode = #tpu.pipeline_mode<synchronous>, transform_indices = @transform_1, window_bounds = array<i64: 8, 8>}, {transform_indices = @transform_2, window_bounds = array<i64: 8, 512>}, {transform_indices = @transform_3, window_bounds = array<i64: 2, 512>}]} {
    %c0 = arith.constant 0 : index
    %c0_0 = arith.constant 0 : index
    %0 = vector.load %arg3[%c0, %c0_0] : memref<8x512xf32, #tpu.memory_space<vmem>>, vector<8x512xf32>
    %c0_1 = arith.constant 0 : index
    %c0_2 = arith.constant 0 : index
    %1 = vector.load %arg1[%c0_1, %c0_2] : memref<8x1xf32, #tpu.memory_space<vmem>>, vector<8x1xf32>
    %c0_3 = arith.constant 0 : index
    %c0_4 = arith.constant 0 : index
    %2 = vector.load %arg2[%c0_3, %c0_4] : memref<8x8xf32, #tpu.memory_space<vmem>>, vector<8x8xf32>
    %3 = arith.negf %0 : vector<8x512xf32>
    %4 = math.exp %3 : vector<8x512xf32>
    %cst = arith.constant 1.000000e+00 : f32
    %5 = vector.broadcast %cst : f32 to vector<8x512xf32>
    %6 = arith.addf %5, %4 : vector<8x512xf32>
    %7 = arith.divf %5, %6 : vector<8x512xf32>
    %8 = arith.mulf %0, %7 : vector<8x512xf32>
    %9 = vector.broadcast %1 : vector<8x1xf32> to vector<8x512xf32>
    %10 = arith.mulf %9, %8 : vector<8x512xf32>
    %cst_5 = arith.constant -2.200000e+00 : f32
    %11 = vector.broadcast %cst_5 : f32 to vector<8x512xf32>
    %12 = arith.cmpf oge, %0, %11 : vector<8x512xf32>
    %13 = arith.extui %12 : vector<8x512xi1> to vector<8x512xi32>
    %14 = arith.sitofp %13 : vector<8x512xi32> to vector<8x512xf32>
    %cst_6 = arith.constant -1.800000e+00 : f32
    %15 = vector.broadcast %cst_6 : f32 to vector<8x512xf32>
    %16 = arith.cmpf oge, %0, %15 : vector<8x512xf32>
    %17 = arith.extui %16 : vector<8x512xi1> to vector<8x512xi32>
    %18 = arith.sitofp %17 : vector<8x512xi32> to vector<8x512xf32>
    %cst_7 = arith.constant -1.400000e+00 : f32
    %19 = vector.broadcast %cst_7 : f32 to vector<8x512xf32>
    %20 = arith.cmpf oge, %0, %19 : vector<8x512xf32>
    %21 = arith.extui %20 : vector<8x512xi1> to vector<8x512xi32>
    %22 = arith.sitofp %21 : vector<8x512xi32> to vector<8x512xf32>
    %cst_8 = arith.constant -1.000000e+00 : f32
    %23 = vector.broadcast %cst_8 : f32 to vector<8x512xf32>
    %24 = arith.cmpf oge, %0, %23 : vector<8x512xf32>
    %25 = arith.extui %24 : vector<8x512xi1> to vector<8x512xi32>
    %26 = arith.sitofp %25 : vector<8x512xi32> to vector<8x512xf32>
    %cst_9 = arith.constant -6.000000e-01 : f32
    %27 = vector.broadcast %cst_9 : f32 to vector<8x512xf32>
    %28 = arith.cmpf oge, %0, %27 : vector<8x512xf32>
    %29 = arith.extui %28 : vector<8x512xi1> to vector<8x512xi32>
    %30 = arith.sitofp %29 : vector<8x512xi32> to vector<8x512xf32>
    %cst_10 = arith.constant -0.199999988 : f32
    %31 = vector.broadcast %cst_10 : f32 to vector<8x512xf32>
    %32 = arith.cmpf oge, %0, %31 : vector<8x512xf32>
    %33 = arith.extui %32 : vector<8x512xi1> to vector<8x512xi32>
    %34 = arith.sitofp %33 : vector<8x512xi32> to vector<8x512xf32>
    %cst_11 = arith.constant 0.200000048 : f32
    %35 = vector.broadcast %cst_11 : f32 to vector<8x512xf32>
    %36 = arith.cmpf oge, %0, %35 : vector<8x512xf32>
    %37 = arith.extui %36 : vector<8x512xi1> to vector<8x512xi32>
    %38 = arith.sitofp %37 : vector<8x512xi32> to vector<8x512xf32>
    %cst_12 = arith.constant 6.000000e-01 : f32
    %39 = vector.broadcast %cst_12 : f32 to vector<8x512xf32>
    %40 = arith.cmpf oge, %0, %39 : vector<8x512xf32>
    %41 = arith.extui %40 : vector<8x512xi1> to vector<8x512xi32>
    %42 = arith.sitofp %41 : vector<8x512xi32> to vector<8x512xf32>
    %cst_13 = arith.constant 1.000000e+00 : f32
    %43 = vector.broadcast %cst_13 : f32 to vector<8x512xf32>
    %44 = arith.cmpf oge, %0, %43 : vector<8x512xf32>
    %45 = arith.extui %44 : vector<8x512xi1> to vector<8x512xi32>
    %46 = arith.sitofp %45 : vector<8x512xi32> to vector<8x512xf32>
    %cst_14 = arith.constant 1.4000001 : f32
    %47 = vector.broadcast %cst_14 : f32 to vector<8x512xf32>
    %48 = arith.cmpf oge, %0, %47 : vector<8x512xf32>
    %49 = arith.extui %48 : vector<8x512xi1> to vector<8x512xi32>
    %50 = arith.sitofp %49 : vector<8x512xi32> to vector<8x512xf32>
    %cst_15 = arith.constant 1.800000e+00 : f32
    %51 = vector.broadcast %cst_15 : f32 to vector<8x512xf32>
    %52 = arith.cmpf oge, %0, %51 : vector<8x512xf32>
    %53 = arith.extui %52 : vector<8x512xi1> to vector<8x512xi32>
    %54 = arith.sitofp %53 : vector<8x512xi32> to vector<8x512xf32>
    %cst_16 = arith.constant 2.200000e+00 : f32
    %55 = vector.broadcast %cst_16 : f32 to vector<8x512xf32>
    %56 = arith.cmpf oge, %0, %55 : vector<8x512xf32>
    %57 = arith.extui %56 : vector<8x512xi1> to vector<8x512xi32>
    %58 = arith.sitofp %57 : vector<8x512xi32> to vector<8x512xf32>
    %59 = arith.subf %14, %18 : vector<8x512xf32>
    %60 = arith.subf %18, %22 : vector<8x512xf32>
    %61 = arith.subf %22, %26 : vector<8x512xf32>
    %62 = arith.subf %26, %30 : vector<8x512xf32>
    %63 = arith.subf %30, %34 : vector<8x512xf32>
    %64 = arith.subf %34, %38 : vector<8x512xf32>
    %65 = arith.subf %38, %42 : vector<8x512xf32>
    %66 = arith.subf %42, %46 : vector<8x512xf32>
    %67 = arith.subf %46, %50 : vector<8x512xf32>
    %68 = arith.subf %50, %54 : vector<8x512xf32>
    %69 = arith.subf %54, %58 : vector<8x512xf32>
    %cst_17 = arith.constant -2.200000e+00 : f32
    %70 = vector.broadcast %cst_17 : f32 to vector<8x512xf32>
    %71 = arith.subf %0, %70 : vector<8x512xf32>
    %cst_18 = arith.constant -1.800000e+00 : f32
    %72 = vector.broadcast %cst_18 : f32 to vector<8x512xf32>
    %73 = arith.subf %0, %72 : vector<8x512xf32>
    %cst_19 = arith.constant -1.400000e+00 : f32
    %74 = vector.broadcast %cst_19 : f32 to vector<8x512xf32>
    %75 = arith.subf %0, %74 : vector<8x512xf32>
    %cst_20 = arith.constant -1.000000e+00 : f32
    %76 = vector.broadcast %cst_20 : f32 to vector<8x512xf32>
    %77 = arith.subf %0, %76 : vector<8x512xf32>
    %cst_21 = arith.constant -6.000000e-01 : f32
    %78 = vector.broadcast %cst_21 : f32 to vector<8x512xf32>
    %79 = arith.subf %0, %78 : vector<8x512xf32>
    %cst_22 = arith.constant -0.199999988 : f32
    %80 = vector.broadcast %cst_22 : f32 to vector<8x512xf32>
    %81 = arith.subf %0, %80 : vector<8x512xf32>
    %cst_23 = arith.constant 0.200000048 : f32
    %82 = vector.broadcast %cst_23 : f32 to vector<8x512xf32>
    %83 = arith.subf %0, %82 : vector<8x512xf32>
    %cst_24 = arith.constant 6.000000e-01 : f32
    %84 = vector.broadcast %cst_24 : f32 to vector<8x512xf32>
    %85 = arith.subf %0, %84 : vector<8x512xf32>
    %cst_25 = arith.constant 1.000000e+00 : f32
    %86 = vector.broadcast %cst_25 : f32 to vector<8x512xf32>
    %87 = arith.subf %0, %86 : vector<8x512xf32>
    %cst_26 = arith.constant 1.4000001 : f32
    %88 = vector.broadcast %cst_26 : f32 to vector<8x512xf32>
    %89 = arith.subf %0, %88 : vector<8x512xf32>
    %cst_27 = arith.constant 1.800000e+00 : f32
    %90 = vector.broadcast %cst_27 : f32 to vector<8x512xf32>
    %91 = arith.subf %0, %90 : vector<8x512xf32>
    %cst_28 = arith.constant 2.200000e+00 : f32
    %92 = vector.broadcast %cst_28 : f32 to vector<8x512xf32>
    %93 = arith.subf %0, %92 : vector<8x512xf32>
    %94 = arith.mulf %71, %59 : vector<8x512xf32>
    %95 = arith.mulf %75, %60 : vector<8x512xf32>
    %96 = arith.subf %94, %95 : vector<8x512xf32>
    %cst_29 = arith.constant 2.49999952 : f32
    %97 = vector.broadcast %cst_29 : f32 to vector<8x512xf32>
    %98 = arith.mulf %96, %97 : vector<8x512xf32>
    %99 = arith.mulf %73, %60 : vector<8x512xf32>
    %100 = arith.mulf %77, %61 : vector<8x512xf32>
    %101 = arith.subf %99, %100 : vector<8x512xf32>
    %cst_30 = arith.constant 2.49999952 : f32
    %102 = vector.broadcast %cst_30 : f32 to vector<8x512xf32>
    %103 = arith.mulf %101, %102 : vector<8x512xf32>
    %104 = arith.mulf %75, %61 : vector<8x512xf32>
    %105 = arith.mulf %79, %62 : vector<8x512xf32>
    %106 = arith.subf %104, %105 : vector<8x512xf32>
    %cst_31 = arith.constant 2.49999952 : f32
    %107 = vector.broadcast %cst_31 : f32 to vector<8x512xf32>
    %108 = arith.mulf %106, %107 : vector<8x512xf32>
    %109 = arith.mulf %77, %62 : vector<8x512xf32>
    %110 = arith.mulf %81, %63 : vector<8x512xf32>
    %111 = arith.subf %109, %110 : vector<8x512xf32>
    %cst_32 = arith.constant 2.49999952 : f32
    %112 = vector.broadcast %cst_32 : f32 to vector<8x512xf32>
    %113 = arith.mulf %111, %112 : vector<8x512xf32>
    %114 = arith.mulf %79, %63 : vector<8x512xf32>
    %115 = arith.mulf %83, %64 : vector<8x512xf32>
    %116 = arith.subf %114, %115 : vector<8x512xf32>
    %cst_33 = arith.constant 2.49999952 : f32
    %117 = vector.broadcast %cst_33 : f32 to vector<8x512xf32>
    %118 = arith.mulf %116, %117 : vector<8x512xf32>
    %119 = arith.mulf %81, %64 : vector<8x512xf32>
    %120 = arith.mulf %85, %65 : vector<8x512xf32>
    %121 = arith.subf %119, %120 : vector<8x512xf32>
    %cst_34 = arith.constant 2.49999952 : f32
    %122 = vector.broadcast %cst_34 : f32 to vector<8x512xf32>
    %123 = arith.mulf %121, %122 : vector<8x512xf32>
    %124 = arith.mulf %83, %65 : vector<8x512xf32>
    %125 = arith.mulf %87, %66 : vector<8x512xf32>
    %126 = arith.subf %124, %125 : vector<8x512xf32>
    %cst_35 = arith.constant 2.49999952 : f32
    %127 = vector.broadcast %cst_35 : f32 to vector<8x512xf32>
    %128 = arith.mulf %126, %127 : vector<8x512xf32>
    %129 = arith.mulf %85, %66 : vector<8x512xf32>
    %130 = arith.mulf %89, %67 : vector<8x512xf32>
    %131 = arith.subf %129, %130 : vector<8x512xf32>
    %cst_36 = arith.constant 2.49999952 : f32
    %132 = vector.broadcast %cst_36 : f32 to vector<8x512xf32>
    %133 = arith.mulf %131, %132 : vector<8x512xf32>
    %134 = arith.mulf %87, %67 : vector<8x512xf32>
    %135 = arith.mulf %91, %68 : vector<8x512xf32>
    %136 = arith.subf %134, %135 : vector<8x512xf32>
    %cst_37 = arith.constant 2.49999952 : f32
    %137 = vector.broadcast %cst_37 : f32 to vector<8x512xf32>
    %138 = arith.mulf %136, %137 : vector<8x512xf32>
    %139 = arith.mulf %89, %68 : vector<8x512xf32>
    %140 = arith.mulf %93, %69 : vector<8x512xf32>
    %141 = arith.subf %139, %140 : vector<8x512xf32>
    %cst_38 = arith.constant 2.49999952 : f32
    %142 = vector.broadcast %cst_38 : f32 to vector<8x512xf32>
    %143 = arith.mulf %141, %142 : vector<8x512xf32>
    %144 = arith.mulf %71, %98 : vector<8x512xf32>
    %145 = arith.mulf %77, %103 : vector<8x512xf32>
    %146 = arith.subf %144, %145 : vector<8x512xf32>
    %cst_39 = arith.constant 1.24999988 : f32
    %147 = vector.broadcast %cst_39 : f32 to vector<8x512xf32>
    %148 = arith.mulf %146, %147 : vector<8x512xf32>
    %149 = arith.mulf %73, %103 : vector<8x512xf32>
    %150 = arith.mulf %79, %108 : vector<8x512xf32>
    %151 = arith.subf %149, %150 : vector<8x512xf32>
    %cst_40 = arith.constant 1.24999988 : f32
    %152 = vector.broadcast %cst_40 : f32 to vector<8x512xf32>
    %153 = arith.mulf %151, %152 : vector<8x512xf32>
    %154 = arith.mulf %75, %108 : vector<8x512xf32>
    %155 = arith.mulf %81, %113 : vector<8x512xf32>
    %156 = arith.subf %154, %155 : vector<8x512xf32>
    %cst_41 = arith.constant 1.24999988 : f32
    %157 = vector.broadcast %cst_41 : f32 to vector<8x512xf32>
    %158 = arith.mulf %156, %157 : vector<8x512xf32>
    %159 = arith.mulf %77, %113 : vector<8x512xf32>
    %160 = arith.mulf %83, %118 : vector<8x512xf32>
    %161 = arith.subf %159, %160 : vector<8x512xf32>
    %cst_42 = arith.constant 1.24999988 : f32
    %162 = vector.broadcast %cst_42 : f32 to vector<8x512xf32>
    %163 = arith.mulf %161, %162 : vector<8x512xf32>
    %164 = arith.mulf %79, %118 : vector<8x512xf32>
    %165 = arith.mulf %85, %123 : vector<8x512xf32>
    %166 = arith.subf %164, %165 : vector<8x512xf32>
    %cst_43 = arith.constant 1.24999988 : f32
    %167 = vector.broadcast %cst_43 : f32 to vector<8x512xf32>
    %168 = arith.mulf %166, %167 : vector<8x512xf32>
    %169 = arith.mulf %81, %123 : vector<8x512xf32>
    %170 = arith.mulf %87, %128 : vector<8x512xf32>
    %171 = arith.subf %169, %170 : vector<8x512xf32>
    %cst_44 = arith.constant 1.24999988 : f32
    %172 = vector.broadcast %cst_44 : f32 to vector<8x512xf32>
    %173 = arith.mulf %171, %172 : vector<8x512xf32>
    %174 = arith.mulf %83, %128 : vector<8x512xf32>
    %175 = arith.mulf %89, %133 : vector<8x512xf32>
    %176 = arith.subf %174, %175 : vector<8x512xf32>
    %cst_45 = arith.constant 1.24999988 : f32
    %177 = vector.broadcast %cst_45 : f32 to vector<8x512xf32>
    %178 = arith.mulf %176, %177 : vector<8x512xf32>
    %179 = arith.mulf %85, %133 : vector<8x512xf32>
    %180 = arith.mulf %91, %138 : vector<8x512xf32>
    %181 = arith.subf %179, %180 : vector<8x512xf32>
    %cst_46 = arith.constant 1.24999988 : f32
    %182 = vector.broadcast %cst_46 : f32 to vector<8x512xf32>
    %183 = arith.mulf %181, %182 : vector<8x512xf32>
    %184 = arith.mulf %87, %138 : vector<8x512xf32>
    %185 = arith.mulf %93, %143 : vector<8x512xf32>
    %186 = arith.subf %184, %185 : vector<8x512xf32>
    %cst_47 = arith.constant 1.24999988 : f32
    %187 = vector.broadcast %cst_47 : f32 to vector<8x512xf32>
    %188 = arith.mulf %186, %187 : vector<8x512xf32>
    %189 = vector.extract_strided_slice %2 {offsets = [0, 0], sizes = [8, 1], strides = [1, 1]} : vector<8x8xf32> to vector<8x1xf32>
    %190 = arith.mulf %71, %148 : vector<8x512xf32>
    %191 = arith.mulf %79, %153 : vector<8x512xf32>
    %192 = arith.subf %190, %191 : vector<8x512xf32>
    %193 = vector.broadcast %189 : vector<8x1xf32> to vector<8x512xf32>
    %194 = arith.mulf %193, %192 : vector<8x512xf32>
    %195 = arith.addf %10, %194 : vector<8x512xf32>
    %196 = vector.extract_strided_slice %2 {offsets = [0, 1], sizes = [8, 1], strides = [1, 1]} : vector<8x8xf32> to vector<8x1xf32>
    %197 = arith.mulf %73, %153 : vector<8x512xf32>
    %198 = arith.mulf %81, %158 : vector<8x512xf32>
    %199 = arith.subf %197, %198 : vector<8x512xf32>
    %200 = vector.broadcast %196 : vector<8x1xf32> to vector<8x512xf32>
    %201 = arith.mulf %200, %199 : vector<8x512xf32>
    %202 = arith.addf %195, %201 : vector<8x512xf32>
    %203 = vector.extract_strided_slice %2 {offsets = [0, 2], sizes = [8, 1], strides = [1, 1]} : vector<8x8xf32> to vector<8x1xf32>
    %204 = arith.mulf %75, %158 : vector<8x512xf32>
    %205 = arith.mulf %83, %163 : vector<8x512xf32>
    %206 = arith.subf %204, %205 : vector<8x512xf32>
    %207 = vector.broadcast %203 : vector<8x1xf32> to vector<8x512xf32>
    %208 = arith.mulf %207, %206 : vector<8x512xf32>
    %209 = arith.addf %202, %208 : vector<8x512xf32>
    %210 = vector.extract_strided_slice %2 {offsets = [0, 3], sizes = [8, 1], strides = [1, 1]} : vector<8x8xf32> to vector<8x1xf32>
    %211 = arith.mulf %77, %163 : vector<8x512xf32>
    %212 = arith.mulf %85, %168 : vector<8x512xf32>
    %213 = arith.subf %211, %212 : vector<8x512xf32>
    %214 = vector.broadcast %210 : vector<8x1xf32> to vector<8x512xf32>
    %215 = arith.mulf %214, %213 : vector<8x512xf32>
    %216 = arith.addf %209, %215 : vector<8x512xf32>
    %217 = vector.extract_strided_slice %2 {offsets = [0, 4], sizes = [8, 1], strides = [1, 1]} : vector<8x8xf32> to vector<8x1xf32>
    %218 = arith.mulf %79, %168 : vector<8x512xf32>
    %219 = arith.mulf %87, %173 : vector<8x512xf32>
    %220 = arith.subf %218, %219 : vector<8x512xf32>
    %221 = vector.broadcast %217 : vector<8x1xf32> to vector<8x512xf32>
    %222 = arith.mulf %221, %220 : vector<8x512xf32>
    %223 = arith.addf %216, %222 : vector<8x512xf32>
    %224 = vector.extract_strided_slice %2 {offsets = [0, 5], sizes = [8, 1], strides = [1, 1]} : vector<8x8xf32> to vector<8x1xf32>
    %225 = arith.mulf %81, %173 : vector<8x512xf32>
    %226 = arith.mulf %89, %178 : vector<8x512xf32>
    %227 = arith.subf %225, %226 : vector<8x512xf32>
    %228 = vector.broadcast %224 : vector<8x1xf32> to vector<8x512xf32>
    %229 = arith.mulf %228, %227 : vector<8x512xf32>
    %230 = arith.addf %223, %229 : vector<8x512xf32>
    %231 = vector.extract_strided_slice %2 {offsets = [0, 6], sizes = [8, 1], strides = [1, 1]} : vector<8x8xf32> to vector<8x1xf32>
    %232 = arith.mulf %83, %178 : vector<8x512xf32>
    %233 = arith.mulf %91, %183 : vector<8x512xf32>
    %234 = arith.subf %232, %233 : vector<8x512xf32>
    %235 = vector.broadcast %231 : vector<8x1xf32> to vector<8x512xf32>
    %236 = arith.mulf %235, %234 : vector<8x512xf32>
    %237 = arith.addf %230, %236 : vector<8x512xf32>
    %238 = vector.extract_strided_slice %2 {offsets = [0, 7], sizes = [8, 1], strides = [1, 1]} : vector<8x8xf32> to vector<8x1xf32>
    %239 = arith.mulf %85, %183 : vector<8x512xf32>
    %240 = arith.mulf %93, %188 : vector<8x512xf32>
    %241 = arith.subf %239, %240 : vector<8x512xf32>
    %242 = vector.broadcast %238 : vector<8x1xf32> to vector<8x512xf32>
    %243 = arith.mulf %242, %241 : vector<8x512xf32>
    %244 = arith.addf %237, %243 : vector<8x512xf32>
    %245 = vector.extract_strided_slice %244 {offsets = [0, 0], sizes = [4, 512], strides = [1, 1]} : vector<8x512xf32> to vector<4x512xf32>
    %cst_48 = arith.constant dense<0.000000e+00> : vector<512xf32>
    %246 = vector.multi_reduction <add>, %245, %cst_48 [0] : vector<4x512xf32> to vector<512xf32>
    %247 = vector.shape_cast %246 : vector<512xf32> to vector<1x512xf32>
    %248 = vector.extract_strided_slice %244 {offsets = [4, 0], sizes = [4, 512], strides = [1, 1]} : vector<8x512xf32> to vector<4x512xf32>
    %cst_49 = arith.constant dense<0.000000e+00> : vector<512xf32>
    %249 = vector.multi_reduction <add>, %248, %cst_49 [0] : vector<4x512xf32> to vector<512xf32>
    %250 = vector.shape_cast %249 : vector<512xf32> to vector<1x512xf32>
    %251 = tpu.concatenate %247, %250 in 0 : vector<1x512xf32>, vector<1x512xf32> -> vector<2x512xf32>
    %c0_50 = arith.constant 0 : index
    %c0_51 = arith.constant 0 : index
    %252 = vector.load %arg4[%c0_50, %c0_51] : memref<2x512xf32, #tpu.memory_space<vmem>>, vector<2x512xf32>
    tpu.vector_store %arg4[%c0_50, %c0_51], %251 {strides = array<i32>} : memref<2x512xf32, #tpu.memory_space<vmem>>, vector<2x512xf32>,
    return
  }
  func.func @transform_0(%arg0: i32) -> (i32, i32) {
    %c0_i32 = arith.constant 0 : i32
    %c0_i32_0 = arith.constant 0 : i32
    %c0_i32_1 = arith.constant 0 : i32
    return %c0_i32, %c0_i32_0 : i32, i32
  }
  func.func @transform_1(%arg0: i32) -> (i32, i32) {
    %c0_i32 = arith.constant 0 : i32
    %c0_i32_0 = arith.constant 0 : i32
    %c0_i32_1 = arith.constant 0 : i32
    return %c0_i32, %c0_i32_0 : i32, i32
  }
  func.func @transform_2(%arg0: i32) -> (i32, i32) {
    %c0_i32 = arith.constant 0 : i32
    %c0_i32_0 = arith.constant 0 : i32
    return %c0_i32, %arg0 : i32, i32
  }
  func.func @transform_3(%arg0: i32) -> (i32, i32) {
    %c0_i32 = arith.constant 0 : i32
    %c0_i32_0 = arith.constant 0 : i32
    return %c0_i32, %arg0 : i32, i32
  }
}

</mosaic_0001>

<bundles_post_ra>
// kernel: tpu_custom_call.1
= control target key start
LH: loop header
LB: loop body
LE: loop exit
PB: predicated region body
PF: predicated region fallthrough
CT: control target
= control target key end

     0   :  { %8 = vsyncpa [#allocation3], 0  ;;  %s2769_s0 = inlined_call_operand.vmem [shape: f32[8,1], index: 0, kind: input, shape index: {}]   ;;  %s2770_s1 = inlined_call_operand.vmem [shape: f32[8,8], index: 1, kind: input, shape index: {}]   ;;  %s2771_s2 = inlined_call_operand.hbm [shape: f32[8,1024], index: 2, kind: input, shape index: {}]   ;;  %s2772_s3 = inlined_call_operand.hbm [shape: f32[2,1024], index: 3, kind: output, shape index: {}]  }
   0x1   :  { %10 = vsyncpa [#allocation3 + $0x1], 0 }
   0x2   :  { %11 = vsyncpa [#allocation4], 0 }
   0x3   :  { %13 = vsyncpa [#allocation4 + $0x1], 0  ;;  %s1478_s12 = smov 0   ;;  %s1480_s13 = smov 0  }
   0x4   :  { %s1482_s14 = smov 0   ;;  %s1484_s15 = smov 0  }
   0x5 LB: > { %s1499_s16 = sadd.s32 4294967295, %s1444_s15   ;;  %s1147_s17 = sadd.s32 4294967294, %s1444_s15   ;;  %s1444_s15 = sphi %s1484_s15, %s3110_s15   ;;  %s1440_s14 = sphi %s1482_s14, %s3109_s14   ;;  %s1436_s13 = sphi %s1480_s13, %s3108_s13   ;;  %s1432_s12 = sphi %s1478_s12, %s3107_s12  }
   0x6   : > { %s1503_s18 = sadd.s32 1, %s1444_s15   ;;  %s68_s19 = sadd.s32 1, %s1440_s14 }
   0x7   : > { %s65_s20 = ssub.s32 %s1444_s15, %s1503_s18  ;;  %p75_p0 = scmp.ne.s32.totalorder %s1440_s14, %s1436_s13 }
   0x8   : > { %p66_p1 = scmp.eq.s32.totalorder %s65_s20, 0  ;;  %p76_p2 = scmp.eq.s32.totalorder %s1444_s15, 0 }
   0x9   : > { %p81_p3 = scmp.ne.s32.totalorder %s1436_s13, %s1432_s12  ;;  %p82_p4 = scmp.eq.s32.totalorder %s1499_s16, 0 }
   0xa   : > { %s1515_s21 = scalar_select %p66_p1, %s1440_s14, %s68_s19  }
   0xb   : > { %p1517_p5 = por %p76_p2, %p75_p0  ;;  %p1521_p6 = por %p82_p4, %p81_p3 }
   0xc   : > { %p105_p7 = scmp.eq.s32.totalorder %s1499_s16, 1  ;;  %p111_p8 = scmp.eq.s32.totalorder %s1147_s17, 1 }
   0xd   : > { %p1275_p10 = scmp.lt.s32.totalorder %s1444_s15, 2  ;;  %s137_s26 = sand.u32 1, %s1440_s14  }
   0xe   : > { %p1528_p11 = por %p105_p7, %p75_p0  ;;  %p1532_p12 = por %p111_p8, %p81_p3 }
   0xf   : > { %s1261_s27 = sshll.u32 %s1444_s15, 9  ;;  %s1150_s28 = sshll.u32 %s137_s26, 5 }
  0x10   : > { %s2879_s24 = scalar_select %p1528_p11, 1, 0 }
  0x11   : > { %s2880_s25 = scalar_select %p1532_p12, 1, 0 }
  0x12   : > { %s1541_s4 = scalar_lea.hbm %s2771_s2, %s1261_s27  ;;  %s141_s5 = scalar_lea.vmem [#allocation2], %s1150_s28 }
  0x13   : > { %s149_s6 = sshll.u32 %s141_s5, 4  ;;  %p1545_p13 = pnand %p1275_p10, %p1517_p5  ;;  %s1549_s6 = int_to_ptr.vmem [resolvable:$true] %s149_s6 }
  0x14   : > { %s138_s8 = scalar_lea.sflag [#allocation3], %s137_s26  ;;  %s1348_s9 = scalar_lea.hbm %s1541_s4, 512 }
  0x15   : > { %p1349_p2 = scmp.ne.s32.totalorder %s1541_s4, %s1348_s9  ;;  %p1350_p3 = pneg %p1545_p13 }
  0x16   : > { %s1353_s17 = scalar_lea.hbm %s2771_s2, 1024  ;;  %p1354_p5 = scmp.lt.u32.totalorder %s1541_s4, %s2771_s2 }
  0x17   : > { %p1351_p4 = pnand %p1350_p3, %p1349_p2  ;;  %p1355_p8 = scmp.lt.u32.totalorder %s1353_s17, %s1348_s9 }
  0x18   : > { %p1357_p9 = scmp.lt.u32.totalorder %s1348_s9, %s1541_s4 }
  0x19   : > { %p1352_p7 = pneg %p1351_p4  ;;  %p1356_p10 = por %p1355_p8, %p1354_p5 }
  0x1b   : > { %p1358_p0 = por %p1357_p9, %p1356_p10 }
  0x1d   : > { %p1359_p1 = pnand %p1358_p0, %p1352_p7 }
  0x1f   : > { %1362 = shalt.err (!%p1359_p1)
}
  0x20   : > { %s1363_s22 = scalar_lea.vmem %s1549_s6, 512  ;;  %s1446_s26 = smov [#allocation2]  }
  0x21   : > { %p1364_p2 = scmp.ne.s32.totalorder %s1549_s6, %s1363_s22  ;;  %s1368_s27 = sshll.u32 %s1446_s26, 4  ;;  %s1369_s27 = int_to_ptr.vmem [resolvable:$false] %s1368_s27 }
  0x22   : > { %s1370_s28 = scalar_lea.vmem %s1369_s27, 1024  ;;  %p1371_p11 = scmp.lt.s32.totalorder %s1549_s6, %s1369_s27 }
  0x23   : > { %p1366_p4 = pnand %p1364_p2, %p1350_p3  ;;  %p1372_p5 = scmp.lt.s32.totalorder %s1370_s28, %s1363_s22 }
  0x25   : > { %p1367_p12 = pneg %p1366_p4  ;;  %p1373_p8 = por %p1372_p5, %p1371_p11 }
  0x27   : > { %p1374_p9 = pnand %p1373_p8, %p1367_p12 }
  0x29   : > { %1377 = shalt.err (!%p1374_p9)
}
  0x2a   : > { %1270 = dma.hbm_to_vmem [thread:$0]  (!%p1545_p13), %s1541_s4, 512, %s1549_s6, %s138_s8  }
  0x2b   : > { %p2882_p0 = scmp.lt.s32.totalorder %s1444_s15, 3  ;;  %p2883_p1 = scmp.ge.s32.totalorder %s1444_s15, 1 }
  0x2d   : > { %p155_p3 = pnand %p2883_p1, %p2882_p0 }
  0x2f   : > { %158 = sbr.rel (%p155_p3) target bundleno = 280 (0x118), region = 32 }
  0x36   : > { %s1583_s29 = sand.u32 1, %s1436_s13  }
  0x37   : > { %s1154_s30 = sshll.u32 %s1583_s29, 5  ;;  %s161_s5 = scalar_lea.sflag [#allocation3], %s1583_s29 }
  0x38   : > { %s1587_s9 = scalar_lea.vmem [#allocation2], %s1154_s30 }
  0x39   : > { %1423 = dma.done.wait (%p1521_p6), %s161_s5, 512  }
  0x3a   : > { %1425 = vsyncadd (%p1521_p6), %s161_s5, 4294966784  ;;  %v1447_v0 = vmov 1   ;;  %v1448_v1 = vmov 0   ;;  %v1594_v2 = vld [vmem:[%s1587_s9] sm:$0xff]  ;;  %v1597_v3 = vld [vmem:[%s1587_s9 + $0x8] sm:$0xff]  ;;  %v2774_v8 = vmov 0.0  }
  0x3b   : > { %1320 = vset.pattern.permute.xlu1 %v1447_v0  ;;  %1319 = vset.pattern.permute.xlu0 %v1448_v1  ;;  %v1600_v4 = vld [vmem:[%s1587_s9 + $0x10] sm:$0xff]  ;;  %v1603_v5 = vld [vmem:[%s1587_s9 + $0x18] sm:$0xff]  ;;  %vm244_vm0 = vcmp.ge.f32.partialorder %v1594_v2, -1.8  ;;  %vm245_vm1 = vcmp.ge.f32.partialorder %v1597_v3, -1.8 }
  0x3c   : > { %2884 = vst [vmem:[#allocation8_spill] sm:$0xff] %v1603_v5  ;;  %v1608_v6 = vld [vmem:[%s2770_s1] sm:$0xff]  ;;  %vm246_vm2 = vcmp.ge.f32.partialorder %v1600_v4, -1.8  ;;  %vm247_vm3 = vcmp.ge.f32.partialorder %v1603_v5, -1.8 }
  0x3d   : > { %v193_v7 = vld [vmem:[%s2769_s0] sm:$0xff]  ;;  %810 = vperm.xlu1 %1320, %v1608_v6   ;;  %v1619_v9 = vsel %vm244_vm0, 1.0, %v2774_v8  ;;  %vm268_vm4 = vcmp.ge.f32.partialorder %v1594_v2, -1.0  ;;  %vm256_vm5 = vcmp.ge.f32.partialorder %v1594_v2, -1.4  ;;  %v1626_v10 = vsel %vm245_vm1, 1.0, %v2774_v8 }
  0x3e   : > { %225 = vperm.xlu0 %1319, %v193_v7   ;;  %vm257_vm6 = vcmp.ge.f32.partialorder %v1597_v3, -1.4  ;;  %vm258_vm7 = vcmp.ge.f32.partialorder %v1600_v4, -1.4  ;;  %v1629_v11 = vsel %vm246_vm2, 1.0, %v2774_v8  ;;  %v1632_v12 = vsel %vm247_vm3, 1.0, %v2774_v8 }
  0x3f   : > { %vm259_vm8 = vcmp.ge.f32.partialorder %v1603_v5, -1.4  ;;  %v1450_v13 = vmov 2   ;;  %v1168_v14 = vsel %vm256_vm5, 1.0, %v2774_v8  ;;  %vm269_vm9 = vcmp.ge.f32.partialorder %v1597_v3, -1.0  ;;  %s1155_s8 = sshll.u32 %s1583_s29, 3 }
  0x40   : > { %vm270_vm10 = vcmp.ge.f32.partialorder %v1600_v4, -1.0  ;;  %vm271_vm11 = vcmp.ge.f32.partialorder %v1603_v5, -1.0  ;;  %v1169_v15 = vsel %vm257_vm6, 1.0, %v2774_v8  ;;  %v1170_v16 = vsel %vm258_vm7, 1.0, %v2774_v8  ;;  %s1262_s10 = sshll.u32 %s1499_s16, 7  ;;  %s186_s11 = scalar_lea.vmem [#allocation5], %s1155_s8 }
  0x41   : > { %1321 = vset.pattern.permute.xlu1 %v1450_v13  ;;  %v1171_v17 = vsel %vm259_vm8, 1.0, %v2774_v8  ;;  %v1172_v18 = vsel %vm268_vm4, 1.0, %v2774_v8  ;;  %vm280_vm12 = vcmp.ge.f32.partialorder %v1594_v2, -0.6  ;;  %vm281_vm13 = vcmp.ge.f32.partialorder %v1597_v3, -0.6  ;;  %s2725_s22 = scalar_lea.hbm %s2772_s3, %s1262_s10 }
  0x42   : > { %786 = vperm.xlu0 %1319, %v1608_v6   ;;  %834 = vperm.xlu1 %1321, %v1608_v6   ;;  %vm282_vm14 = vcmp.ge.f32.partialorder %v1600_v4, -0.6  ;;  %v1173_v19 = vsel %vm269_vm9, 1.0, %v2774_v8  ;;  %v1174_v20 = vsel %vm270_vm10, 1.0, %v2774_v8  ;;  %v1175_v21 = vsel %vm271_vm11, 1.0, %v2774_v8  ;;  %s1077_s17 = sshll.u32 %s186_s11, 4  ;;  %s2727_s17 = int_to_ptr.vmem [resolvable:$true] %s1077_s17 }
  0x43   : > { %vm283_vm15 = vcmp.ge.f32.partialorder %v1603_v5, -0.6  ;;  %v1451_v22 = vmov 3   ;;  %v1176_v23 = vsel %vm280_vm12, 1.0, %v2774_v8  ;;  %vm292_vm0 = vcmp.ge.f32.partialorder %v1594_v2, -0.19999999 }
  0x44   : > { %vm293_vm1 = vcmp.ge.f32.partialorder %v1597_v3, -0.19999999  ;;  %v1658_v24 = vsub.f32 %v1619_v9, %v1168_v14  ;;  %v1452_v25 = vmov 4   ;;  %v1177_v26 = vsel %vm281_vm13, 1.0, %v2774_v8  ;;  %s1063_s26 = scalar_lea.sflag [#allocation4], %s1583_s29  ;;  %s1378_s27 = scalar_lea.vmem %s2727_s17, 128 }
  0x45   : > { %v1178_v27 = vsel %vm282_vm14, 1.0, %v2774_v8  ;;  %vm294_vm2 = vcmp.ge.f32.partialorder %v1600_v4, -0.19999999  ;;  %vm295_vm3 = vcmp.ge.f32.partialorder %v1603_v5, -0.19999999  ;;  %v1179_v28 = vsel %vm283_vm15, 1.0, %v2774_v8  ;;  %p1379_p6 = scmp.ne.s32.totalorder %s2727_s17, %s1378_s27 }
  0x46   : > { %1322 = vset.pattern.permute.xlu0 %v1451_v22  ;;  %1323 = vset.pattern.permute.xlu1 %v1452_v25  ;;  %v1668_v29 = vsel %vm292_vm0, 1.0, %v2774_v8  ;;  %v1671_v30 = vsel %vm293_vm1, 1.0, %v2774_v8  ;;  %v1674_v31 = vsub.f32 %v1626_v10, %v1169_v15  ;;  %v1677_v32 = vsel %vm294_vm2, 1.0, %v2774_v8  ;;  %p3104_p11 = scmp.ne.s32.totalorder %s2879_s24, 0  ;;  %s1457_s16 = smov [#allocation5]  }
  0x47   : > { %858 = vperm.xlu0 %1322, %v1608_v6   ;;  %882 = vperm.xlu1 %1323, %v1608_v6   ;;  %2885 = vst [vmem:[#allocation9_spill] sm:$0xff] %v1668_v29  ;;  %2886 = vst [vmem:[#allocation10_spill] sm:$0xff] %v1671_v30  ;;  %v1680_v33 = vsel %vm295_vm3, 1.0, %v2774_v8  ;;  %v1683_v34 = vsub.f32 %v1629_v11, %v1170_v16  ;;  %v1686_v35 = vsub.f32 %v1632_v12, %v1171_v17  ;;  %v1453_v40 = vmov 6   ;;  %s1382_s28 = sshll.u32 %s1457_s16, 4  ;;  %s1383_s28 = int_to_ptr.vmem [resolvable:$false] %s1382_s28 }
  0x48   : > { %2887 = vst [vmem:[#allocation11_spill] sm:$0xff] %v1677_v32  ;;  %2888 = vst [vmem:[#allocation12_spill] sm:$0xff] %v1680_v33  ;;  %v384_v36 = vsub.f32 %v1168_v14, %v1172_v18  ;;  %v385_v37 = vsub.f32 %v1169_v15, %v1173_v19  ;;  %v386_v38 = vsub.f32 %v1170_v16, %v1174_v20  ;;  %v1454_v45 = vmov 5   ;;  %p1380_p12 = pnand %p1379_p6, %p3104_p11  ;;  %s1384_s30 = scalar_lea.vmem %s1383_s28, 256 }
  0x49   : > { %v387_v39 = vsub.f32 %v1171_v17, %v1175_v21  ;;  %v388_v41 = vsub.f32 %v1172_v18, %v1176_v23  ;;  %v389_v42 = vsub.f32 %v1173_v19, %v1177_v26  ;;  %v1688_v43 = vsub.f32 %v1174_v20, %v1178_v27  ;;  %p1385_p7 = scmp.lt.s32.totalorder %s2727_s17, %s1383_s28  ;;  %p1386_p10 = scmp.lt.s32.totalorder %s1384_s30, %s1378_s27 }
  0x4a   : > { %v1690_v44 = vsub.f32 %v1175_v21, %v1179_v28  ;;  %v1694_v46 = vsub.f32 %v1176_v23, %v1668_v29  ;;  %v1697_v47 = vsub.f32 %v1177_v26, %v1671_v30  ;;  %v1700_v48 = vsub.f32 %v1178_v27, %v1677_v32  ;;  %p1381_p13 = pneg %p1380_p12 }
  0x4b   : > { %1325 = vset.pattern.permute.xlu0 %v1453_v40  ;;  %1324 = vset.pattern.permute.xlu1 %v1454_v45  ;;  %v1703_v49 = vadd.f32 1.8, %v1594_v2  ;;  %v1707_v50 = vsub.f32 %v1179_v28, %v1680_v33  ;;  %v1710_v51 = vadd.f32 1.8, %v1597_v3  ;;  %v1713_v52 = vadd.f32 1.8, %v1600_v4  ;;  %p1387_p2 = por %p1386_p10, %p1385_p7 }
  0x4c   : > { %930 = vperm.xlu0 %1325, %v1608_v6   ;;  %2889 = vst [vmem:[#allocation13_spill] sm:$0xff] %v1697_v47  ;;  %2890 = vst [vmem:[#allocation14_spill] sm:$0xff] %v1700_v48  ;;  %906 = vperm.xlu1 %1324, %v1608_v6   ;;  %v1716_v53 = vadd.f32 1.8, %v1603_v5  ;;  %v1719_v54 = vadd.f32 1.4, %v1594_v2 }
  0x4d   : > { %2891 = vst [vmem:[#allocation15_spill] sm:$0xff] %v1707_v50  ;;  %v1722_v55 = vadd.f32 1.4, %v1597_v3  ;;  %v1725_v56 = vadd.f32 1.0, %v1594_v2  ;;  %v1728_v57 = vadd.f32 1.0, %v1597_v3  ;;  %v1737_v60 = vadd.f32 1.0, %v1600_v4  ;;  %p1388_p4 = pnand %p1387_p2, %p1381_p13 }
  0x4e   : > { %2892 = vst [vmem:[#allocation16_spill] sm:$0xff] %v1719_v54  ;;  %v1731_v58 = vadd.f32 1.4, %v1600_v4  ;;  %v1734_v59 = vadd.f32 1.4, %v1603_v5  ;;  %v1740_v61 = vadd.f32 1.0, %v1603_v5  ;;  %v484_v1 = vmul.f32 %v1703_v49, %v1658_v24 }
  0x4f   : > { %2893 = vst [vmem:[#allocation17_spill] sm:$0xff] %v1725_v56  ;;  %2894 = vst [vmem:[#allocation18_spill] sm:$0xff] %v1728_v57  ;;  %v1743_v62 = vadd.f32 0.6, %v1594_v2  ;;  %v1746_v63 = vadd.f32 0.6, %v1597_v3  ;;  %v485_v16 = vmul.f32 %v1710_v51, %v1674_v31  ;;  %v486_v17 = vmul.f32 %v1713_v52, %v1683_v34 }
  0x50   : > { %2895 = vst [vmem:[#allocation19_spill] sm:$0xff] %v1731_v58  ;;  %2896 = vst [vmem:[#allocation20_spill] sm:$0xff] %v1734_v59  ;;  %v1749_v0 = vadd.f32 0.6, %v1600_v4  ;;  %v1455_v7 = vmov 7   ;;  %v487_v18 = vmul.f32 %v1716_v53, %v1686_v35  ;;  %v488_v19 = vmul.f32 %v1725_v56, %v384_v36 }
  0x51   : > { %2897 = vst [vmem:[#allocation21_spill] sm:$0xff] %v1737_v60  ;;  %2898 = vst [vmem:[#allocation22_spill] sm:$0xff] %v1740_v61  ;;  %1327 = vset.pattern.permute.xlu0 %v1455_v7  ;;  %1326 = vset.pattern.permute.xlu1 %v1455_v7  ;;  %v1754_v13 = vadd.f32 0.6, %v1603_v5  ;;  %v1757_v14 = vadd.f32 0.19999999, %v1594_v2  ;;  %v489_v20 = vmul.f32 %v1728_v57, %v385_v37 }
  0x52   : > { %2899 = vst [vmem:[#allocation23_spill] sm:$0xff] %v1746_v63  ;;  %2900 = vst [vmem:[#allocation24_spill] sm:$0xff] %v1749_v0  ;;  %v1760_v15 = vadd.f32 0.19999999, %v1597_v3  ;;  %954 = vperm.xlu1 %1326, %v1608_v6   ;;  %v490_v21 = vmul.f32 %v1737_v60, %v386_v38  ;;  %v491_v22 = vmul.f32 %v1740_v61, %v387_v39  ;;  %v1778_v40 = vadd.f32 0.19999999, %v1600_v4 }
  0x53   : > { %2901 = vst [vmem:[#allocation25_spill] sm:$0xff] %v1757_v14  ;;  %v500_v23 = vmul.f32 %v1719_v54, %v384_v36  ;;  %v501_v25 = vmul.f32 %v1722_v55, %v385_v37  ;;  %v492_v26 = vsub.f32 %v484_v1, %v488_v19  ;;  %v493_v6 = vsub.f32 %v485_v16, %v489_v20 }
  0x54   : > { %v502_v27 = vmul.f32 %v1731_v58, %v386_v38  ;;  %v503_v28 = vmul.f32 %v1734_v59, %v387_v39  ;;  %v1781_v45 = vadd.f32 0.19999999, %v1603_v5  ;;  %v504_v7 = vmul.f32 %v1743_v62, %v388_v41 }
  0x55   : > { %v505_v8 = vmul.f32 %v1746_v63, %v389_v42  ;;  %v494_v33 = vsub.f32 %v486_v17, %v490_v21  ;;  %v495_v36 = vsub.f32 %v487_v18, %v491_v22  ;;  %v506_v37 = vmul.f32 %v1749_v0, %v1688_v43 }
  0x56   : > { %2902 = vst [vmem:[#allocation26_spill] sm:$0xff] %v1781_v45  ;;  %v507_v38 = vmul.f32 %v1754_v13, %v1690_v44  ;;  %v1789_v1 = vmul.f32 2.4999995, %v492_v26  ;;  %v1791_v39 = vmul.f32 2.4999995, %v493_v6  ;;  %v508_v16 = vsub.f32 %v500_v23, %v504_v7 }
  0x57   : > { %v509_v19 = vsub.f32 %v501_v25, %v505_v8  ;;  %v510_v20 = vsub.f32 %v502_v27, %v506_v37  ;;  %v516_v30 = vmul.f32 %v1725_v56, %v388_v41  ;;  %v517_v29 = vmul.f32 %v1728_v57, %v389_v42 }
  0x58   : > { %v511_v32 = vsub.f32 %v503_v28, %v507_v38  ;;  %v512_v17 = vmul.f32 2.4999995, %v508_v16  ;;  %v518_v21 = vmul.f32 %v1737_v60, %v1688_v43  ;;  %v519_v22 = vmul.f32 %v1740_v61, %v1690_v44 }
  0x59   : > { %v513_v18 = vmul.f32 2.4999995, %v509_v19  ;;  %v1799_v26 = vmul.f32 2.4999995, %v494_v33  ;;  %v1801_v6 = vmul.f32 2.4999995, %v495_v36  ;;  %v520_v8 = vmul.f32 %v1757_v14, %v1694_v46 }
  0x5a   : > { %v521_v41 = vmul.f32 %v1760_v15, %v1697_v47  ;;  %v514_v23 = vmul.f32 2.4999995, %v510_v20  ;;  %v515_v42 = vmul.f32 2.4999995, %v511_v32  ;;  %v522_v25 = vmul.f32 %v1778_v40, %v1700_v48 }
  0x5b   : > { %v523_v43 = vmul.f32 %v1781_v45, %v1707_v50  ;;  %v524_v27 = vsub.f32 %v516_v30, %v520_v8  ;;  %v644_v33 = vmul.f32 %v1703_v49, %v1789_v1  ;;  %v645_v28 = vmul.f32 %v1710_v51, %v1791_v39 }
  0x5c   : > { %v525_v44 = vsub.f32 %v517_v29, %v521_v41  ;;  %v526_v7 = vsub.f32 %v518_v21, %v522_v25  ;;  %v648_v37 = vmul.f32 %v1743_v62, %v512_v17  ;;  %v649_v32 = vmul.f32 %v1746_v63, %v513_v18 }
  0x5d   : > { %v527_v36 = vsub.f32 %v519_v22, %v523_v43  ;;  %v1817_v38 = vmul.f32 2.4999995, %v524_v27  ;;  %v646_v30 = vmul.f32 %v1713_v52, %v1799_v26  ;;  %v650_v29 = vmul.f32 %v1749_v0, %v514_v23 }
  0x5e   : > { %v1819_v16 = vmul.f32 2.4999995, %v525_v44  ;;  %v647_v19 = vmul.f32 %v1716_v53, %v1801_v6  ;;  %v651_v20 = vmul.f32 %v1754_v13, %v515_v42  ;;  %v652_v21 = vsub.f32 %v644_v33, %v648_v37 }
  0x5f   : > { %v653_v22 = vsub.f32 %v645_v28, %v649_v32  ;;  %v1827_v8 = vmul.f32 2.4999995, %v526_v7  ;;  %v1829_v41 = vmul.f32 2.4999995, %v527_v36  ;;  %v660_v25 = vmul.f32 %v1719_v54, %v512_v17 }
  0x60   : > { %v661_v43 = vmul.f32 %v1722_v55, %v513_v18  ;;  %v664_v27 = vmul.f32 %v1757_v14, %v1817_v38  ;;  %v665_v44 = vmul.f32 %v1760_v15, %v1819_v16  ;;  %v654_v50 = vsub.f32 %v646_v30, %v650_v29 }
  0x61   : > { %v655_v48 = vsub.f32 %v647_v19, %v651_v20  ;;  %v1837_v47 = vmul.f32 1.2499999, %v652_v21  ;;  %v1839_v33 = vmul.f32 1.2499999, %v653_v22  ;;  %v662_v28 = vmul.f32 %v1731_v58, %v514_v23 }
  0x62   : > { %v663_v7 = vmul.f32 %v1734_v59, %v515_v42  ;;  %v666_v17 = vmul.f32 %v1778_v40, %v1827_v8  ;;  %v667_v18 = vmul.f32 %v1781_v45, %v1829_v41  ;;  %v668_v36 = vsub.f32 %v660_v25, %v664_v27 }
  0x63   : > { %v669_v37 = vsub.f32 %v661_v43, %v665_v44  ;;  %v1156_v32 = vmul.f32 -1.442695, %v1594_v2  ;;  %v1848_v30 = vmul.f32 1.2499999, %v654_v50  ;;  %v1157_v29 = vmul.f32 -1.442695, %v1597_v3 }
  0x64   : > { %v1851_v19 = vmul.f32 1.2499999, %v655_v48  ;;  %v1855_v23 = vmul.f32 %v1703_v49, %v1837_v47  ;;  %v1859_v42 = vmul.f32 %v1710_v51, %v1839_v33  ;;  %vm232_vm4 = vcmp.ge.f32.partialorder %v1594_v2, -2.2 }
  0x65   : > { %v670_v20 = vsub.f32 %v662_v28, %v666_v17  ;;  %v671_v21 = vsub.f32 %v663_v7, %v667_v18  ;;  %v1862_v22 = vmul.f32 1.2499999, %v668_v36  ;;  %vm233_vm5 = vcmp.ge.f32.partialorder %v1597_v3, -2.2 }
  0x66   : > { %2903 = vst [vmem:[#allocation27_spill] sm:$0xff] %v1855_v23  ;;  %2904 = vst [vmem:[#allocation28_spill] sm:$0xff] %v1859_v42  ;;  %v1865_v50 = vmul.f32 1.2499999, %v669_v37  ;;  %1328 = vpow2.f32 %v1156_v32  ;;  %v1158_v48 = vmul.f32 -1.442695, %v1600_v4  ;;  %v472_v25 = vmul.f32 %v1719_v54, %v1658_v24 }
  0x67   : > { %vm234_vm6 = vcmp.ge.f32.partialorder %v1600_v4, -2.2  ;;  %1330 = vpow2.f32 %v1157_v29  ;;  %vm235_vm7 = vcmp.ge.f32.partialorder %v1603_v5, -2.2  ;;  %v2905_v49 = vmov 0.0   ;;  %v2926_v42 = vld [vmem:[#allocation15_spill] sm:$0xff] }
  0x68   : > { %v1160_v51 = vsel %vm232_vm4, 1.0, %v2905_v49  ;;  %v1161_v43 = vsel %vm233_vm5, 1.0, %v2905_v49  ;;  %v1162_v27 = vsel %vm234_vm6, 1.0, %v2905_v49  ;;  %v1163_v44 = vsel %vm235_vm7, 1.0, %v2905_v49 }
  0x69   : > { %v376_v28 = vsub.f32 %v1160_v51, %v1619_v9  ;;  %v377_v7 = vsub.f32 %v1161_v43, %v1626_v10  ;;  %v378_v17 = vsub.f32 %v1162_v27, %v1629_v11  ;;  %v379_v18 = vsub.f32 %v1163_v44, %v1632_v12 }
  0x6a   : > { %v1881_v36 = vadd.f32 2.2, %v1594_v2  ;;  %v1884_v37 = vadd.f32 2.2, %v1597_v3  ;;  %v1887_v24 = vadd.f32 2.2, %v1600_v4  ;;  %v473_v9 = vmul.f32 %v1722_v55, %v1674_v31 }
  0x6b   : > { %v1890_v32 = vadd.f32 2.2, %v1603_v5  ;;  %v1894_v10 = vmul.f32 1.2499999, %v670_v20  ;;  %v474_v12 = vmul.f32 %v1731_v58, %v1683_v34  ;;  %v475_v29 = vmul.f32 %v1734_v59, %v1686_v35 }
  0x6c   : > { %v468_v11 = vmul.f32 %v1881_v36, %v376_v28  ;;  %v1159_v51 = vmul.f32 -1.442695, %v1603_v5  ;;  %v469_v43 = vmul.f32 %v1884_v37, %v377_v7  ;;  %v470_v27 = vmul.f32 %v1887_v24, %v378_v17 }
  0x6d   : > { %v471_v44 = vmul.f32 %v1890_v32, %v379_v18  ;;  %v1905_v54 = vmul.f32 1.2499999, %v671_v21  ;;  %v1909_v31 = vmul.f32 %v1757_v14, %v1862_v22  ;;  %v1913_v34 = vmul.f32 %v1760_v15, %v1865_v50 }
  0x6e   : > { %v476_v20 = vsub.f32 %v468_v11, %v472_v25  ;;  %1332 = vpow2.f32 %v1158_v48  ;;  %v477_v35 = vsub.f32 %v469_v43, %v473_v9  ;;  %v478_v28 = vsub.f32 %v470_v27, %v474_v12 }
  0x6f   : > { %2906 = vst [vmem:[#allocation29_spill] sm:$0xff] %v1905_v54  ;;  %2907 = vst [vmem:[#allocation30_spill] sm:$0xff] %v1909_v31  ;;  %v479_v59 = vsub.f32 %v471_v44, %v475_v29  ;;  %v1917_v7 = vmul.f32 %v1713_v52, %v1848_v30  ;;  %v1921_v21 = vmul.f32 %v1716_v53, %v1851_v19  ;;  %1334 = vpow2.f32 %v1159_v51  ;;  %v2916_v29 = vld [vmem:[#allocation9_spill] sm:$0xff] }
  0x70   : > { %2908 = vst [vmem:[#allocation31_spill] sm:$0xff] %v1913_v34  ;;  %v480_v17 = vmul.f32 2.4999995, %v476_v20  ;;  %v1329_v18 = vpop.eup %1328  ;;  %v481_v14 = vmul.f32 2.4999995, %v477_v35  ;;  %v632_v25 = vmul.f32 %v1725_v56, %v1789_v1  ;;  %v1927_v9 = vmul.f32 %v1778_v40, %v1894_v10 }
  0x71   : > { %2909 = vst [vmem:[#allocation32_spill] sm:$0xff] %v1917_v7  ;;  %2910 = vst [vmem:[#allocation33_spill] sm:$0xff] %v1921_v21  ;;  %v482_v58 = vmul.f32 2.4999995, %v478_v28  ;;  %v1331_v48 = vpop.eup %1330  ;;  %v1931_v52 = vmul.f32 %v1781_v45, %v1905_v54  ;;  %v483_v11 = vmul.f32 2.4999995, %v479_v59  ;;  %v633_v51 = vmul.f32 %v1728_v57, %v1791_v39 }
  0x72   : > { %2911 = vst [vmem:[#allocation34_spill] sm:$0xff] %v1927_v9  ;;  %v628_v53 = vmul.f32 %v1881_v36, %v480_v17  ;;  %v629_v1 = vmul.f32 %v1884_v37, %v481_v14  ;;  %v634_v27 = vmul.f32 %v1737_v60, %v1799_v26  ;;  %v635_v59 = vmul.f32 %v1740_v61, %v1801_v6 }
  0x73   : > { %2912 = vst [vmem:[#allocation35_spill] sm:$0xff] %v1931_v52  ;;  %v630_v43 = vmul.f32 %v1887_v24, %v482_v58  ;;  %vm304_vm8 = vcmp.ge.f32.partialorder %v1594_v2, 0.20000005  ;;  %v631_v44 = vmul.f32 %v1890_v32, %v483_v11  ;;  %vm305_vm9 = vcmp.ge.f32.partialorder %v1597_v3, 0.20000005 }
  0x74   : > { %v636_v20 = vsub.f32 %v628_v53, %v632_v25  ;;  %vm306_vm10 = vcmp.ge.f32.partialorder %v1600_v4, 0.20000005  ;;  %v1956_v39 = vmul.f32 %v1743_v62, %v1837_v47  ;;  %vm307_vm11 = vcmp.ge.f32.partialorder %v1603_v5, 0.20000005 }
  0x75   : > { %v637_v26 = vsub.f32 %v629_v1, %v633_v51  ;;  %v1960_v6 = vsel %vm304_vm8, 1.0, %v2905_v49  ;;  %v1963_v35 = vsel %vm305_vm9, 1.0, %v2905_v49  ;;  %v1966_v28 = vsel %vm306_vm10, 1.0, %v2905_v49 }
  0x76   : > { %2913 = vst [vmem:[#allocation36_spill] sm:$0xff] %v1956_v39  ;;  %v207_v17 = vadd.f32 1.0, %v1329_v18  ;;  %v208_v25 = vadd.f32 1.0, %v1331_v48  ;;  %v1970_v11 = vmul.f32 %v1746_v63, %v1839_v33  ;;  %v1973_v47 = vsel %vm307_vm11, 1.0, %v2905_v49  ;;  %v2917_v18 = vld [vmem:[#allocation10_spill] sm:$0xff]  ;;  %v2918_v33 = vld [vmem:[#allocation11_spill] sm:$0xff] }
  0x77   : > { %v638_v1 = vsub.f32 %v630_v43, %v634_v27  ;;  %v639_v51 = vsub.f32 %v631_v44, %v635_v59  ;;  %v640_v58 = vmul.f32 1.2499999, %v636_v20  ;;  %v1977_v14 = vmul.f32 %v1749_v0, %v1848_v30  ;;  %v2920_v30 = vld [vmem:[#allocation12_spill] sm:$0xff] }
  0x78   : > { %2914 = vst [vmem:[#allocation37_spill] sm:$0xff] %v1970_v11  ;;  %v1333_v53 = vpop.eup %1332  ;;  %v1981_v12 = vsub.f32 %v2916_v29, %v1960_v6  ;;  %v1985_v48 = vsub.f32 %v2917_v18, %v1963_v35  ;;  %v1989_v52 = vsub.f32 %v2918_v33, %v1966_v28  ;;  %v1992_v43 = vadd.f32 -0.20000005, %v1594_v2 }
  0x79   : > { %2915 = vst [vmem:[#allocation38_spill] sm:$0xff] %v1977_v14  ;;  %v1335_v27 = vpop.eup %1334  ;;  %v641_v59 = vmul.f32 1.2499999, %v637_v26  ;;  %v1996_v44 = vsub.f32 %v2920_v30, %v1973_v47  ;;  %v1999_v29 = vadd.f32 -0.20000005, %v1597_v3  ;;  %v209_v18 = vadd.f32 1.0, %v1333_v53 }
  0x7a   : > { %2919 = vst [vmem:[#allocation9_spill] sm:$0xff] %v1992_v43  ;;  %v2002_v20 = vadd.f32 -0.20000005, %v1600_v4  ;;  %1336 = vrcp.f32 %v207_v17  ;;  %v2005_v33 = vadd.f32 -0.20000005, %v1603_v5  ;;  %v532_v21 = vmul.f32 %v1743_v62, %v1694_v46  ;;  %v2924_v26 = vld [vmem:[#allocation13_spill] sm:$0xff] }
  0x7b   : > { %2921 = vst [vmem:[#allocation10_spill] sm:$0xff] %v1999_v29  ;;  %v642_v9 = vmul.f32 1.2499999, %v638_v1  ;;  %v533_v7 = vmul.f32 %v1746_v63, %v2924_v26  ;;  %v2925_v30 = vld [vmem:[#allocation14_spill] sm:$0xff]  ;;  %v535_v31 = vmul.f32 %v1754_v13, %v2926_v42  ;;  %v210_v23 = vadd.f32 1.0, %v1335_v27 }
  0x7c   : > { %2922 = vst [vmem:[#allocation11_spill] sm:$0xff] %v2002_v20  ;;  %2923 = vst [vmem:[#allocation12_spill] sm:$0xff] %v2005_v33  ;;  %v534_v34 = vmul.f32 %v1749_v0, %v2925_v30  ;;  %v536_v17 = vmul.f32 %v1992_v43, %v1981_v12  ;;  %v537_v53 = vmul.f32 %v1999_v29, %v1985_v48  ;;  %v643_v1 = vmul.f32 1.2499999, %v639_v51 }
  0x7d   : > { %v538_v46 = vmul.f32 %v2002_v20, %v1989_v52  ;;  %v2022_v54 = vmul.f32 %v1881_v36, %v640_v58  ;;  %v2025_v26 = vmul.f32 %v1884_v37, %v641_v59  ;;  %v539_v42 = vmul.f32 %v2005_v33, %v1996_v44 }
  0x7e   : > { %1338 = vrcp.f32 %v208_v25  ;;  %v540_v27 = vsub.f32 %v532_v21, %v536_v17  ;;  %v541_v30 = vsub.f32 %v533_v7, %v537_v53  ;;  %v2030_v63 = vmul.f32 %v1887_v24, %v642_v9 }
  0x7f   : > { %2927 = vst [vmem:[#allocation13_spill] sm:$0xff] %v2022_v54  ;;  %2928 = vst [vmem:[#allocation14_spill] sm:$0xff] %v2025_v26  ;;  %v542_v0 = vsub.f32 %v534_v34, %v538_v46  ;;  %1340 = vrcp.f32 %v209_v18  ;;  %v2034_v51 = vmul.f32 %v1754_v13, %v1851_v19  ;;  %v543_v36 = vsub.f32 %v535_v31, %v539_v42  ;;  %v2935_v46 = vld [vmem:[#allocation19_spill] sm:$0xff] }
  0x80   : > { %2929 = vst [vmem:[#allocation15_spill] sm:$0xff] %v2030_v63  ;;  %1342 = vrcp.f32 %v210_v23  ;;  %v2036_v58 = vmul.f32 2.4999995, %v540_v27  ;;  %v2038_v37 = vmul.f32 2.4999995, %v541_v30  ;;  %v2043_v21 = vmul.f32 %v1890_v32, %v643_v1 }
  0x81   : > { %2930 = vst [vmem:[#allocation39_spill] sm:$0xff] %v2034_v51  ;;  %v2040_v59 = vmul.f32 2.4999995, %v542_v0  ;;  %v2049_v7 = vmul.f32 2.4999995, %v543_v36  ;;  %v676_v19 = vmul.f32 %v1725_v56, %v1817_v38  ;;  %v677_v23 = vmul.f32 %v1728_v57, %v1819_v16  ;;  %v2932_v38 = vld [vmem:[#allocation16_spill] sm:$0xff] }
  0x82   : > { %2931 = vst [vmem:[#allocation40_spill] sm:$0xff] %v2043_v21  ;;  %v680_v0 = vmul.f32 %v1992_v43, %v2036_v58  ;;  %v681_v32 = vmul.f32 %v1999_v29, %v2038_v37  ;;  %v2063_v9 = vmul.f32 %v1737_v60, %v1827_v8  ;;  %v2067_v25 = vmul.f32 %v1740_v61, %v1829_v41 }
  0x83   : > { %v2071_v16 = vmul.f32 %v2932_v38, %v1862_v22  ;;  %v2077_v17 = vmul.f32 %v2002_v20, %v2040_v59  ;;  %vm316_vm12 = vcmp.ge.f32.partialorder %v1594_v2, 0.6  ;;  %vm317_vm13 = vcmp.ge.f32.partialorder %v1597_v3, 0.6 }
  0x84   : > { %v2073_v18 = vpop.eup %1336  ;;  %vm318_vm14 = vcmp.ge.f32.partialorder %v1600_v4, 0.6  ;;  %v2084_v8 = vmul.f32 %v2005_v33, %v2049_v7  ;;  %vm319_vm15 = vcmp.ge.f32.partialorder %v1603_v5, 0.6  ;;  %vm328_vm0 = vcmp.ge.f32.partialorder %v1594_v2, 1.0 }
  0x85   : > { %2933 = vst [vmem:[#allocation16_spill] sm:$0xff] %v2071_v16  ;;  %vm329_vm1 = vcmp.ge.f32.partialorder %v1597_v3, 1.0  ;;  %v684_v41 = vsub.f32 %v676_v19, %v680_v0  ;;  %v685_v22 = vsub.f32 %v677_v23, %v681_v32  ;;  %v2091_v53 = vmul.f32 %v1722_v55, %v1865_v50 }
  0x86   : > { %v2095_v1 = vmul.f32 %v2935_v46, %v1894_v10  ;;  %v1188_v42 = vsel %vm316_vm12, 1.0, %v2905_v49  ;;  %v1189_v27 = vsel %vm317_vm13, 1.0, %v2905_v49  ;;  %vm330_vm2 = vcmp.ge.f32.partialorder %v1600_v4, 1.0 }
  0x87   : > { %2934 = vst [vmem:[#allocation41_spill] sm:$0xff] %v2091_v53  ;;  %vm331_vm3 = vcmp.ge.f32.partialorder %v1603_v5, 1.0  ;;  %v1190_v36 = vsel %vm318_vm14, 1.0, %v2905_v49  ;;  %v1191_v19 = vsel %vm319_vm15, 1.0, %v2905_v49  ;;  %v2106_v55 = vsel %vm328_vm0, 1.0, %v2905_v49 }
  0x88   : > { %2936 = vst [vmem:[#allocation19_spill] sm:$0xff] %v2095_v1  ;;  %v2101_v30 = vpop.eup %1338  ;;  %2937 = vst [vmem:[#allocation42_spill] sm:$0xff] %v2106_v55  ;;  %v2109_v50 = vsel %vm329_vm1, 1.0, %v2905_v49  ;;  %v2118_v32 = vsel %vm330_vm2, 1.0, %v2905_v49  ;;  %v2121_v38 = vsel %vm331_vm3, 1.0, %v2905_v49  ;;  %v400_v34 = vsub.f32 %v1960_v6, %v1188_v42 }
  0x89   : > { %2938 = vst [vmem:[#allocation43_spill] sm:$0xff] %v2109_v50  ;;  %v2111_v10 = vpop.eup %1340  ;;  %2939 = vst [vmem:[#allocation44_spill] sm:$0xff] %v2118_v32  ;;  %v2125_v31 = vmul.f32 1.2499999, %v684_v41  ;;  %v2127_v24 = vmul.f32 1.2499999, %v685_v22  ;;  %v401_v14 = vsub.f32 %v1963_v35, %v1189_v27  ;;  %v402_v23 = vsub.f32 %v1966_v28, %v1190_v36 }
  0x8a   : > { %2940 = vst [vmem:[#allocation45_spill] sm:$0xff] %v2121_v38  ;;  %v2123_v46 = vpop.eup %1342  ;;  %v403_v0 = vsub.f32 %v1973_v47, %v1191_v19  ;;  %v2134_v63 = vsub.f32 %v1188_v42, %v2106_v55  ;;  %v2137_v11 = vsub.f32 %v1189_v27, %v2109_v50  ;;  %v2140_v26 = vsub.f32 %v1190_v36, %v2118_v32 }
  0x8b   : > { %2941 = vst [vmem:[#allocation46_spill] sm:$0xff] %v2123_v46  ;;  %v2143_v41 = vsub.f32 %v1191_v19, %v2121_v38  ;;  %v2146_v6 = vadd.f32 -0.6, %v1594_v2  ;;  %v2149_v35 = vadd.f32 -0.6, %v1597_v3  ;;  %v2158_v22 = vadd.f32 -1.0, %v1594_v2 }
  0x8c   : > { %2942 = vst [vmem:[#allocation47_spill] sm:$0xff] %v2140_v26  ;;  %v2152_v28 = vadd.f32 -0.6, %v1600_v4  ;;  %v2155_v47 = vadd.f32 -0.6, %v1603_v5  ;;  %v2161_v42 = vadd.f32 -1.0, %v1597_v3  ;;  %v549_v54 = vmul.f32 %v1760_v15, %v1985_v48 }
  0x8d   : > { %2944 = vst [vmem:[#allocation49_spill] sm:$0xff] %v2158_v22  ;;  %v2164_v27 = vadd.f32 -1.0, %v1600_v4  ;;  %v2167_v36 = vadd.f32 -1.0, %v1603_v5  ;;  %v2948_v19 = vld [vmem:[#allocation25_spill] sm:$0xff]  ;;  %v550_v61 = vmul.f32 %v1778_v40, %v1989_v52  ;;  %v551_v60 = vmul.f32 %v1781_v45, %v1996_v44 }
  0x8e   : > { %2943 = vst [vmem:[#allocation48_spill] sm:$0xff] %v2155_v47  ;;  %2945 = vst [vmem:[#allocation50_spill] sm:$0xff] %v2161_v42  ;;  %v548_v39 = vmul.f32 %v2948_v19, %v1981_v12  ;;  %v552_v38 = vmul.f32 %v2146_v6, %v400_v34  ;;  %v553_v32 = vmul.f32 %v2149_v35, %v401_v14  ;;  %vm340_vm4 = vcmp.ge.f32.partialorder %v1594_v2, 1.4000001 }
  0x8f   : > { %2946 = vst [vmem:[#allocation51_spill] sm:$0xff] %v2164_v27  ;;  %2947 = vst [vmem:[#allocation52_spill] sm:$0xff] %v2167_v36  ;;  %v554_v50 = vmul.f32 %v2152_v28, %v402_v23  ;;  %v555_v55 = vmul.f32 %v2155_v47, %v403_v0  ;;  %v564_v49 = vmul.f32 %v1992_v43, %v400_v34  ;;  %vm341_vm5 = vcmp.ge.f32.partialorder %v1597_v3, 1.4000001 }
  0x90   : > { %v565_v12 = vmul.f32 %v1999_v29, %v401_v14  ;;  %v556_v57 = vsub.f32 %v548_v39, %v552_v38  ;;  %v557_v48 = vsub.f32 %v549_v54, %v553_v32  ;;  %v566_v56 = vmul.f32 %v2002_v20, %v402_v23 }
  0x91   : > { %v567_v52 = vmul.f32 %v2005_v33, %v403_v0  ;;  %v558_v1 = vsub.f32 %v550_v61, %v554_v50  ;;  %v559_v44 = vsub.f32 %v551_v60, %v555_v55  ;;  %v568_v53 = vmul.f32 %v2158_v22, %v2134_v63  ;;  %v2949_v50 = vld [vmem:[#allocation23_spill] sm:$0xff] }
  0x92   : > { %v569_v16 = vmul.f32 %v2161_v42, %v2137_v11  ;;  %v560_v46 = vmul.f32 2.4999995, %v556_v57  ;;  %v561_v5 = vmul.f32 2.4999995, %v557_v48  ;;  %v570_v34 = vmul.f32 %v2164_v27, %v2140_v26  ;;  %v2950_v48 = vld [vmem:[#allocation24_spill] sm:$0xff] }
  0x93   : > { %v571_v54 = vmul.f32 %v2167_v36, %v2143_v41  ;;  %v562_v14 = vmul.f32 2.4999995, %v558_v1  ;;  %v563_v39 = vmul.f32 2.4999995, %v559_v44  ;;  %v572_v23 = vsub.f32 %v564_v49, %v568_v53 }
  0x94   : > { %v573_v0 = vsub.f32 %v565_v12, %v569_v16  ;;  %v574_v61 = vsub.f32 %v566_v56, %v570_v34  ;;  %v692_v55 = vmul.f32 %v1743_v62, %v2036_v58  ;;  %v693_v32 = vmul.f32 %v2949_v50, %v2038_v37 }
  0x95   : > { %v575_v60 = vsub.f32 %v567_v52, %v571_v54  ;;  %v2197_v57 = vmul.f32 2.4999995, %v572_v23  ;;  %v694_v26 = vmul.f32 %v2950_v48, %v2040_v59  ;;  %v695_v1 = vmul.f32 %v1754_v13, %v2049_v7 }
  0x96   : > { %v2199_v38 = vmul.f32 2.4999995, %v573_v0  ;;  %v2205_v49 = vmul.f32 2.4999995, %v574_v61  ;;  %v696_v16 = vmul.f32 %v2146_v6, %v560_v46  ;;  %v697_v58 = vmul.f32 %v2149_v35, %v561_v5 }
  0x97   : > { %v2207_v56 = vmul.f32 2.4999995, %v575_v60  ;;  %v698_v37 = vmul.f32 %v2152_v28, %v562_v14  ;;  %v699_v53 = vmul.f32 %v2155_v47, %v563_v39  ;;  %v708_v12 = vmul.f32 %v2948_v19, %v560_v46 }
  0x98   : > { %v709_v52 = vmul.f32 %v1760_v15, %v561_v5  ;;  %v2951_v59 = vsub.f32 %v2063_v9, %v2077_v17  ;;  %v2952_v44 = vsub.f32 %v2067_v25, %v2084_v8  ;;  %v700_v54 = vsub.f32 %v692_v55, %v696_v16  ;;  %v2953_v8 = vld [vmem:[#allocation29_spill] sm:$0xff]  ;;  %v2954_v55 = vld [vmem:[#allocation20_spill] sm:$0xff] }
  0x99   : > { %v701_v23 = vsub.f32 %v693_v32, %v697_v58  ;;  %v702_v0 = vsub.f32 %v694_v26, %v698_v37  ;;  %v703_v61 = vsub.f32 %v695_v1, %v699_v53  ;;  %v712_v60 = vmul.f32 %v2158_v22, %v2197_v57 }
  0x9a   : > { %v2218_v7 = vmul.f32 1.2499999, %v2951_v59  ;;  %v2223_v34 = vmul.f32 1.2499999, %v2952_v44  ;;  %v713_v5 = vmul.f32 %v2161_v42, %v2199_v38  ;;  %v710_v46 = vmul.f32 %v1778_v40, %v562_v14 }
  0x9b   : > { %v711_v9 = vmul.f32 %v1781_v45, %v563_v39  ;;  %v714_v17 = vmul.f32 %v2164_v27, %v2205_v49  ;;  %v715_v25 = vmul.f32 %v2167_v36, %v2207_v56  ;;  %v2237_v26 = vmul.f32 %v2954_v55, %v2953_v8  ;;  %v2964_v45 = vld [vmem:[#allocation46_spill] sm:$0xff] }
  0x9c   : > { %v2241_v32 = vmul.f32 %v1992_v43, %v2125_v31  ;;  %v716_v1 = vsub.f32 %v708_v12, %v712_v60  ;;  %v717_v16 = vsub.f32 %v709_v52, %v713_v5  ;;  %v2245_v14 = vmul.f32 %v1999_v29, %v2127_v24 }
  0x9d   : > { %2955 = vst [vmem:[#allocation25_spill] sm:$0xff] %v2237_v26  ;;  %v2249_v39 = vmul.f32 %v2002_v20, %v2218_v7  ;;  %v2253_v58 = vmul.f32 %v2005_v33, %v2223_v34  ;;  %v704_v37 = vmul.f32 1.2499999, %v700_v54  ;;  %v2257_v53 = vmul.f32 %v2073_v18, %v1594_v2  ;;  %v2963_v54 = vld [vmem:[#allocation8_spill] sm:$0xff] }
  0x9e   : > { %2956 = vst [vmem:[#allocation23_spill] sm:$0xff] %v2241_v32  ;;  %2957 = vst [vmem:[#allocation24_spill] sm:$0xff] %v2245_v14  ;;  %v705_v59 = vmul.f32 1.2499999, %v701_v23  ;;  %v706_v12 = vmul.f32 1.2499999, %v702_v0  ;;  %v2261_v44 = vmul.f32 %v2101_v30, %v1597_v3  ;;  %v718_v5 = vsub.f32 %v710_v46, %v714_v17 }
  0x9f   : > { %2958 = vst [vmem:[#allocation29_spill] sm:$0xff] %v2249_v39  ;;  %2959 = vst [vmem:[#allocation20_spill] sm:$0xff] %v2253_v58  ;;  %v707_v52 = vmul.f32 1.2499999, %v703_v61  ;;  %v719_v8 = vsub.f32 %v711_v9, %v715_v25  ;;  %v2267_v55 = vmul.f32 %v2111_v10, %v1600_v4  ;;  %v2271_v18 = vmul.f32 %v2964_v45, %v2963_v54  ;;  %v2973_v9 = vld [vmem:[#allocation17_spill] sm:$0xff]  ;;  %v2982_v58 = vld [vmem:[#allocation43_spill] sm:$0xff] }
  0xa0   : > { %2960 = vst [vmem:[#allocation53_spill] sm:$0xff] %v2257_v53  ;;  %2961 = vst [vmem:[#allocation54_spill] sm:$0xff] %v2261_v44  ;;  %v2273_v23 = vmul.f32 1.2499999, %v716_v1  ;;  %v2275_v0 = vmul.f32 1.2499999, %v717_v16  ;;  %v2286_v17 = vmul.f32 %v1743_v62, %v704_v37  ;;  %v2289_v45 = vmul.f32 %v2949_v50, %v705_v59 }
  0xa1   : > { %2962 = vst [vmem:[#allocation55_spill] sm:$0xff] %v2267_v55  ;;  %2965 = vst [vmem:[#allocation8_spill] sm:$0xff] %v2271_v18  ;;  %v2292_v25 = vmul.f32 %v2950_v48, %v706_v12  ;;  %v2295_v1 = vmul.f32 %v1754_v13, %v707_v52  ;;  %v2297_v16 = vmul.f32 1.2499999, %v718_v5  ;;  %v2299_v60 = vmul.f32 1.2499999, %v719_v8 }
  0xa2   : > { %2969 = vst [vmem:[#allocation46_spill] sm:$0xff] %v2286_v17  ;;  %2970 = vst [vmem:[#allocation56_spill] sm:$0xff] %v2289_v45  ;;  %v2303_v61 = vmul.f32 %v2973_v9, %v2125_v31  ;;  %v2974_v62 = vld [vmem:[#allocation18_spill] sm:$0xff]  ;;  %v2311_v50 = vmul.f32 %v2158_v22, %v2273_v23  ;;  %v2315_v13 = vmul.f32 %v2161_v42, %v2275_v0  ;;  %vm342_vm6 = vcmp.ge.f32.partialorder %v1600_v4, 1.4000001  ;;  %v2984_v39 = vld [vmem:[#allocation44_spill] sm:$0xff] }
  0xa3   : > { %2971 = vst [vmem:[#allocation57_spill] sm:$0xff] %v2292_v25  ;;  %2972 = vst [vmem:[#allocation58_spill] sm:$0xff] %v2295_v1  ;;  %v2307_v10 = vmul.f32 %v2974_v62, %v2127_v24  ;;  %vm343_vm7 = vcmp.ge.f32.partialorder %v2963_v54, 1.4000001  ;;  %v2977_v31 = vmov 0.0   ;;  %v2980_v9 = vld [vmem:[#allocation42_spill] sm:$0xff]  ;;  %v581_v51 = vmul.f32 %v2149_v35, %v2137_v11 }
  0xa4   : > { %2975 = vst [vmem:[#allocation17_spill] sm:$0xff] %v2311_v50  ;;  %2976 = vst [vmem:[#allocation18_spill] sm:$0xff] %v2315_v13  ;;  %v2322_v48 = vsel %vm340_vm4, 1.0, %v2977_v31  ;;  %v2325_v24 = vsel %vm341_vm5, 1.0, %v2977_v31  ;;  %v2328_v5 = vsel %vm342_vm6, 1.0, %v2977_v31  ;;  %v2331_v8 = vsel %vm343_vm7, 1.0, %v2977_v31 }
  0xa5   : > { %2978 = vst [vmem:[#allocation59_spill] sm:$0xff] %v2328_v5  ;;  %2979 = vst [vmem:[#allocation60_spill] sm:$0xff] %v2331_v8  ;;  %v2335_v62 = vsub.f32 %v2980_v9, %v2322_v48  ;;  %v2339_v26 = vsub.f32 %v2982_v58, %v2325_v24  ;;  %v2343_v46 = vsub.f32 %v2984_v39, %v2328_v5  ;;  %v2986_v14 = vld [vmem:[#allocation45_spill] sm:$0xff]  ;;  %v2350_v32 = vadd.f32 -1.4000001, %v1594_v2  ;;  %v3040_v17 = vld [vmem:[#allocation14_spill] sm:$0xff] }
  0xa6   : > { %v2347_v44 = vsub.f32 %v2986_v14, %v2331_v8  ;;  %v2353_v30 = vadd.f32 -1.4000001, %v1597_v3  ;;  %v2356_v9 = vadd.f32 -1.4000001, %v1600_v4  ;;  %v2359_v58 = vadd.f32 -1.4000001, %v2963_v54 }
  0xa7   : > { %2981 = vst [vmem:[#allocation42_spill] sm:$0xff] %v2335_v62  ;;  %2983 = vst [vmem:[#allocation43_spill] sm:$0xff] %v2339_v26  ;;  %v580_v39 = vmul.f32 %v2146_v6, %v2134_v63  ;;  %v2989_v14 = vld [vmem:[#allocation47_spill] sm:$0xff]  ;;  %v583_v18 = vmul.f32 %v2155_v47, %v2143_v41  ;;  %v584_v55 = vmul.f32 %v2350_v32, %v2335_v62  ;;  %v2990_v42 = vld [vmem:[#allocation21_spill] sm:$0xff]  ;;  %vm352_vm8 = vcmp.ge.f32.partialorder %v1594_v2, 1.8 }
  0xa8   : > { %2985 = vst [vmem:[#allocation44_spill] sm:$0xff] %v2343_v46  ;;  %2987 = vst [vmem:[#allocation45_spill] sm:$0xff] %v2347_v44  ;;  %v582_v21 = vmul.f32 %v2152_v28, %v2989_v14  ;;  %v585_v53 = vmul.f32 %v2353_v30, %v2339_v26  ;;  %v2375_v8 = vmul.f32 %v2990_v42, %v2218_v7  ;;  %v2991_v63 = vld [vmem:[#allocation22_spill] sm:$0xff]  ;;  %vm353_vm9 = vcmp.ge.f32.partialorder %v1597_v3, 1.8  ;;  %v3030_v1 = vld [vmem:[#allocation33_spill] sm:$0xff] }
  0xa9   : > { %2988 = vst [vmem:[#allocation61_spill] sm:$0xff] %v2356_v9  ;;  %v2379_v5 = vmul.f32 %v2991_v63, %v2223_v34  ;;  %v586_v11 = vmul.f32 %v2356_v9, %v2343_v46  ;;  %v587_v41 = vmul.f32 %v2359_v58, %v2347_v44  ;;  %v2387_v14 = vmul.f32 %v2164_v27, %v2297_v16  ;;  %v3035_v13 = vld [vmem:[#allocation55_spill] sm:$0xff]  ;;  %v3037_v50 = vld [vmem:[#allocation13_spill] sm:$0xff] }
  0xaa   : > { %v2391_v26 = vmul.f32 %v2167_v36, %v2299_v60  ;;  %v588_v42 = vsub.f32 %v580_v39, %v584_v55  ;;  %v589_v7 = vsub.f32 %v581_v51, %v585_v53  ;;  %v2394_v22 = vmul.f32 %v2146_v6, %v704_v37 }
  0xab   : > { %2992 = vst [vmem:[#allocation47_spill] sm:$0xff] %v2387_v14  ;;  %v2397_v34 = vmul.f32 %v2149_v35, %v705_v59  ;;  %v590_v63 = vsub.f32 %v582_v21, %v586_v11  ;;  %v591_v46 = vsub.f32 %v583_v18, %v587_v41  ;;  %v2400_v44 = vmul.f32 %v2152_v28, %v706_v12 }
  0xac   : > { %2993 = vst [vmem:[#allocation21_spill] sm:$0xff] %v2391_v26  ;;  %v2403_v27 = vmul.f32 %v2155_v47, %v707_v52  ;;  %v2405_v62 = vmul.f32 2.4999995, %v588_v42  ;;  %v2407_v36 = vmul.f32 2.4999995, %v589_v7  ;;  %v724_v37 = vmul.f32 %v1992_v43, %v2197_v57  ;;  %v3021_v43 = vld [vmem:[#allocation27_spill] sm:$0xff] }
  0xad   : > { %v2409_v55 = vmul.f32 2.4999995, %v590_v63  ;;  %v2411_v51 = vmul.f32 2.4999995, %v591_v46  ;;  %v725_v21 = vmul.f32 %v1999_v29, %v2199_v38  ;;  %v726_v53 = vmul.f32 %v2002_v20, %v2205_v49  ;;  %v3020_v20 = vld [vmem:[#allocation52_spill] sm:$0xff]  ;;  %v3028_v26 = vld [vmem:[#allocation34_spill] sm:$0xff] }
  0xae   : > { %v727_v59 = vmul.f32 %v2005_v33, %v2207_v56  ;;  %v728_v12 = vmul.f32 %v2350_v32, %v2405_v62  ;;  %v729_v52 = vmul.f32 %v2353_v30, %v2407_v36  ;;  %vm354_vm10 = vcmp.ge.f32.partialorder %v1600_v4, 1.8  ;;  %v3043_v47 = vld [vmem:[#allocation15_spill] sm:$0xff] }
  0xaf   : > { %2994 = vst [vmem:[#allocation22_spill] sm:$0xff] %v2411_v51  ;;  %v730_v57 = vmul.f32 %v2356_v9, %v2409_v55  ;;  %v731_v38 = vmul.f32 %v2359_v58, %v2411_v51  ;;  %vm355_vm11 = vcmp.ge.f32.partialorder %v2963_v54, 1.8  ;;  %v2448_v41 = vsel %vm352_vm8, 1.0, %v2977_v31 }
  0xb0   : > { %v732_v11 = vsub.f32 %v724_v37, %v728_v12  ;;  %2995 = vst [vmem:[#allocation62_spill] sm:$0xff] %v2448_v41  ;;  %v2451_v42 = vsel %vm353_vm9, 1.0, %v2977_v31  ;;  %v733_v63 = vsub.f32 %v725_v21, %v729_v52  ;;  %v2457_v54 = vmul.f32 %v2948_v19, %v2273_v23  ;;  %v2478_v19 = vld [vmem:[%s1587_s9] sm:$0xff]  ;;  %v2484_v23 = vld [vmem:[%s1587_s9 + $0x8] sm:$0xff] }
  0xb1   : > { %2996 = vst [vmem:[#allocation63_spill] sm:$0xff] %v2451_v42  ;;  %v734_v18 = vsub.f32 %v726_v53, %v730_v57  ;;  %v735_v4 = vsub.f32 %v727_v59, %v731_v38  ;;  %v2461_v2 = vmul.f32 %v1760_v15, %v2275_v0  ;;  %v2464_v37 = vsel %vm354_vm10, 1.0, %v2977_v31  ;;  %3002 = vst [vmem:[#allocation69_spill] sm:$0xff] %v2478_v19  ;;  %v3007_v52 = vld [vmem:[#allocation42_spill] sm:$0xff]  ;;  %v3008_v57 = vld [vmem:[#allocation49_spill] sm:$0xff] }
  0xb2   : > { %2998 = vst [vmem:[#allocation65_spill] sm:$0xff] %v2464_v37  ;;  %v2467_v12 = vsel %vm355_vm11, 1.0, %v2977_v31  ;;  %v2471_v56 = vsub.f32 %v2322_v48, %v2448_v41  ;;  %v2475_v21 = vsub.f32 %v2325_v24, %v2451_v42  ;;  %v2481_v15 = vadd.f32 -1.8, %v2478_v19  ;;  %3003 = vst [vmem:[#allocation70_spill] sm:$0xff] %v2484_v23  ;;  %v3005_v24 = vld [vmem:[#allocation26_spill] sm:$0xff] }
  0xb3   : > { %2997 = vst [vmem:[#allocation64_spill] sm:$0xff] %v2461_v2  ;;  %2999 = vst [vmem:[#allocation66_spill] sm:$0xff] %v2467_v12  ;;  %v2487_v0 = vadd.f32 -1.8, %v2484_v23  ;;  %v2489_v53 = vmul.f32 1.2499999, %v732_v11  ;;  %v2493_v48 = vmul.f32 %v1778_v40, %v2297_v16  ;;  %v2497_v59 = vmul.f32 %v3005_v24, %v2299_v60 }
  0xb4   : > { %3000 = vst [vmem:[#allocation67_spill] sm:$0xff] %v2471_v56  ;;  %3001 = vst [vmem:[#allocation68_spill] sm:$0xff] %v2475_v21  ;;  %v596_v38 = vmul.f32 %v3008_v57, %v3007_v52  ;;  %v2501_v3 = vmul.f32 1.2499999, %v733_v63  ;;  %v2503_v39 = vmul.f32 1.2499999, %v734_v18 }
  0xb5   : > { %3004 = vst [vmem:[#allocation71_spill] sm:$0xff] %v2493_v48  ;;  %3006 = vst [vmem:[#allocation26_spill] sm:$0xff] %v2497_v59  ;;  %v2505_v46 = vmul.f32 1.2499999, %v735_v4  ;;  %v3009_v11 = vld [vmem:[#allocation59_spill] sm:$0xff]  ;;  %v3011_v40 = vld [vmem:[#allocation60_spill] sm:$0xff]  ;;  %v601_v29 = vmul.f32 %v2487_v0, %v2475_v21 }
  0xb6   : > { %v2509_v33 = vsub.f32 %v3009_v11, %v2464_v37  ;;  %v2513_v16 = vsub.f32 %v3011_v40, %v2467_v12  ;;  %v2516_v60 = vld [vmem:[%s1587_s9 + $0x10] sm:$0xff]  ;;  %v2522_v52 = vld [vmem:[%s1587_s9 + $0x18] sm:$0xff]  ;;  %v3015_v63 = vld [vmem:[#allocation43_spill] sm:$0xff]  ;;  %v600_v12 = vmul.f32 %v2481_v15, %v2471_v56  ;;  %vm965_vm0 = vcmask 1043456  }
  0xb7   : > { %3013 = vst [vmem:[#allocation60_spill] sm:$0xff] %v2516_v60  ;;  %v2519_v24 = vadd.f32 -1.8, %v2516_v60  ;;  %3014 = vst [vmem:[#allocation72_spill] sm:$0xff] %v2522_v52  ;;  %v2525_v18 = vadd.f32 -1.8, %v2522_v52 }
  0xb8   : > { %3010 = vst [vmem:[#allocation42_spill] sm:$0xff] %v2509_v33  ;;  %3012 = vst [vmem:[#allocation59_spill] sm:$0xff] %v2513_v16  ;;  %v3016_v4 = vld [vmem:[#allocation50_spill] sm:$0xff]  ;;  %v3017_v42 = vld [vmem:[#allocation44_spill] sm:$0xff]  ;;  %vm1034_vm1 = vcmask 1040384  }
  0xb9   : > { %v597_v57 = vmul.f32 %v3016_v4, %v3015_v63  ;;  %v3018_v11 = vld [vmem:[#allocation51_spill] sm:$0xff]  ;;  %v3019_v41 = vld [vmem:[#allocation45_spill] sm:$0xff]  ;;  %v3022_v31 = vld [vmem:[#allocation30_spill] sm:$0xff] }
  0xba   : > { %v598_v37 = vmul.f32 %v3018_v11, %v3017_v42  ;;  %v599_v40 = vmul.f32 %v3020_v20, %v3019_v41  ;;  %v3023_v60 = vsub.f32 %v3021_v43, %v3022_v31  ;;  %v3024_v23 = vld [vmem:[#allocation28_spill] sm:$0xff]  ;;  %v3025_v19 = vld [vmem:[#allocation31_spill] sm:$0xff]  ;;  %v3033_v56 = vld [vmem:[#allocation53_spill] sm:$0xff] }
  0xbb   : > { %v3026_v59 = vsub.f32 %v3024_v23, %v3025_v19  ;;  %v3027_v4 = vld [vmem:[#allocation32_spill] sm:$0xff]  ;;  %v3031_v41 = vld [vmem:[#allocation35_spill] sm:$0xff]  ;;  %v3034_v48 = vld [vmem:[#allocation54_spill] sm:$0xff] }
  0xbc   : > { %v811_v49 = vpop.permute.xlu1 %810  ;;  %v3029_v42 = vsub.f32 %v3027_v4, %v3028_v26  ;;  %v3032_v20 = vsub.f32 %v3030_v1, %v3031_v41  ;;  %v3036_v43 = vld [vmem:[#allocation8_spill] sm:$0xff]  ;;  %v3041_v26 = vld [vmem:[#allocation37_spill] sm:$0xff]  ;;  %v3044_v1 = vld [vmem:[#allocation38_spill] sm:$0xff] }
  0xbd   : > { %v226_v7 = vpop.permute.xlu0 %225  ;;  %v813_v52 = vmul.f32 %v811_v49, %v3023_v60  ;;  %v814_v63 = vmul.f32 %v811_v49, %v3026_v59  ;;  %v3038_v19 = vld [vmem:[#allocation36_spill] sm:$0xff]  ;;  %v3042_v4 = vsub.f32 %v3040_v17, %v3041_v26  ;;  %v3047_v41 = vld [vmem:[#allocation39_spill] sm:$0xff] }
  0xbe   : > { %v815_v11 = vmul.f32 %v811_v49, %v3029_v42  ;;  %v816_v14 = vmul.f32 %v811_v49, %v3032_v20  ;;  %v228_v25 = vmul.f32 %v226_v7, %v3033_v56  ;;  %v229_v21 = vmul.f32 %v226_v7, %v3034_v48  ;;  %v3046_v56 = vld [vmem:[#allocation40_spill] sm:$0xff] }
  0xbf   : > { %v230_v45 = vmul.f32 %v226_v7, %v3035_v13  ;;  %v231_v31 = vmul.f32 %v226_v7, %v3036_v43  ;;  %v3039_v23 = vsub.f32 %v3037_v50, %v3038_v19  ;;  %v3045_v20 = vsub.f32 %v3043_v47, %v3044_v1  ;;  %v3049_v2 = vld [vmem:[#allocation16_spill] sm:$0xff]  ;;  %v3050_v47 = vld [vmem:[#allocation23_spill] sm:$0xff] }
  0xc0   : > { %v3048_v48 = vsub.f32 %v3046_v56, %v3047_v41  ;;  %v602_v7 = vmul.f32 %v2519_v24, %v2509_v33  ;;  %v603_v50 = vmul.f32 %v2525_v18, %v2513_v16  ;;  %v604_v43 = vsub.f32 %v596_v38, %v600_v12  ;;  %v3058_v16 = vld [vmem:[#allocation25_spill] sm:$0xff]  ;;  %v3059_v33 = vld [vmem:[#allocation20_spill] sm:$0xff] }
  0xc1   : > { %v787_v60 = vpop.permute.xlu0 %786  ;;  %v835_v13 = vpop.permute.xlu1 %834  ;;  %v605_v19 = vsub.f32 %v597_v57, %v601_v29  ;;  %v3051_v1 = vsub.f32 %v3049_v2, %v3050_v47  ;;  %v898_v56 = vmul.f32 %v2353_v30, %v2501_v3  ;;  %v899_v41 = vmul.f32 %v2356_v9, %v2503_v39 }
  0xc2   : > { %v789_v59 = vmul.f32 %v787_v60, %v3039_v23  ;;  %v790_v42 = vmul.f32 %v787_v60, %v3042_v4  ;;  %v791_v49 = vmul.f32 %v787_v60, %v3045_v20  ;;  %v792_v51 = vmul.f32 %v787_v60, %v3048_v48 }
  0xc3   : > { %v837_v20 = vmul.f32 %v835_v13, %v3051_v1  ;;  %v897_v60 = vmul.f32 %v2350_v32, %v2489_v53  ;;  %v606_v2 = vsub.f32 %v598_v37, %v602_v7  ;;  %v3060_v9 = vsub.f32 %v3058_v16, %v3059_v33 }
  0xc4   : > { %v793_v23 = vadd.f32 %v789_v59, %v228_v25  ;;  %v794_v17 = vadd.f32 %v790_v42, %v229_v21  ;;  %v795_v26 = vadd.f32 %v791_v49, %v230_v45  ;;  %v796_v4 = vadd.f32 %v792_v51, %v231_v31  ;;  %v3052_v45 = vld [vmem:[#allocation41_spill] sm:$0xff]  ;;  %v3053_v51 = vld [vmem:[#allocation24_spill] sm:$0xff]  ;;  %v3055_v42 = vld [vmem:[#allocation19_spill] sm:$0xff] }
  0xc5   : > { %v3054_v57 = vsub.f32 %v3052_v45, %v3053_v51  ;;  %v607_v31 = vsub.f32 %v599_v40, %v603_v50  ;;  %v2581_v59 = vmul.f32 2.4999995, %v604_v43  ;;  %v3056_v49 = vld [vmem:[#allocation29_spill] sm:$0xff]  ;;  %v3061_v37 = vsub.f32 %v2303_v61, %v2394_v22 }
  0xc6   : > { %v817_v48 = vadd.f32 %v813_v52, %v793_v23  ;;  %v818_v12 = vadd.f32 %v814_v63, %v794_v17  ;;  %v819_v29 = vadd.f32 %v815_v11, %v795_v26  ;;  %v820_v25 = vadd.f32 %v816_v14, %v796_v4  ;;  %v859_v21 = vpop.permute.xlu0 %858  ;;  %v883_v33 = vpop.permute.xlu1 %882 }
  0xc7   : > { %v838_v38 = vmul.f32 %v835_v13, %v3054_v57  ;;  %v3057_v47 = vsub.f32 %v3055_v42, %v3056_v49  ;;  %v840_v52 = vmul.f32 %v835_v13, %v3060_v9  ;;  %v2591_v14 = vmul.f32 %v2359_v58, %v2505_v46  ;;  %v3071_v57 = vld [vmem:[#allocation56_spill] sm:$0xff] }
  0xc8   : > { %v2593_v11 = vmul.f32 2.4999995, %v605_v19  ;;  %v841_v63 = vadd.f32 %v837_v20, %v817_v48  ;;  %v861_v40 = vmul.f32 %v859_v21, %v3061_v37  ;;  %v3062_v7 = vsub.f32 %v2307_v10, %v2397_v34  ;;  %v3065_v20 = vld [vmem:[#allocation64_spill] sm:$0xff]  ;;  %v3079_v37 = vld [vmem:[#allocation21_spill] sm:$0xff] }
  0xc9   : > { %v839_v1 = vmul.f32 %v835_v13, %v3057_v47  ;;  %v842_v23 = vadd.f32 %v838_v38, %v818_v12  ;;  %v844_v17 = vadd.f32 %v840_v52, %v820_v25  ;;  %v3063_v9 = vsub.f32 %v2375_v8, %v2400_v44  ;;  %v3066_v12 = vld [vmem:[#allocation22_spill] sm:$0xff]  ;;  %v3075_v47 = vld [vmem:[#allocation57_spill] sm:$0xff] }
  0xca   : > { %v862_v50 = vmul.f32 %v859_v21, %v3062_v7  ;;  %v3064_v13 = vsub.f32 %v2379_v5, %v2403_v27  ;;  %v2607_v26 = vmul.f32 2.4999995, %v606_v2  ;;  %v2609_v4 = vmul.f32 2.4999995, %v607_v31  ;;  %v3072_v38 = vld [vmem:[#allocation18_spill] sm:$0xff] }
  0xcb   : > { %v843_v43 = vadd.f32 %v839_v1, %v819_v29  ;;  %v863_v16 = vmul.f32 %v859_v21, %v3063_v9  ;;  %v740_v22 = vmul.f32 %v2146_v6, %v2405_v62  ;;  %v744_v61 = vmul.f32 %v2481_v15, %v2581_v59  ;;  %v3067_v62 = vld [vmem:[#allocation48_spill] sm:$0xff]  ;;  %v3076_v1 = vld [vmem:[#allocation47_spill] sm:$0xff]  ;;  %v3081_v9 = vld [vmem:[#allocation26_spill] sm:$0xff] }
  0xcc   : > { %v864_v19 = vmul.f32 %v859_v21, %v3064_v13  ;;  %v901_v10 = vsub.f32 %v2457_v54, %v897_v60  ;;  %v741_v44 = vmul.f32 %v2149_v35, %v2407_v36  ;;  %v742_v8 = vmul.f32 %v2152_v28, %v2409_v55  ;;  %v3068_v60 = vld [vmem:[#allocation46_spill] sm:$0xff]  ;;  %v3069_v55 = vld [vmem:[#allocation17_spill] sm:$0xff] }
  0xcd   : > { %v745_v27 = vmul.f32 %v2487_v0, %v2593_v11  ;;  %v865_v5 = vadd.f32 %v861_v40, %v841_v63  ;;  %v866_v34 = vadd.f32 %v862_v50, %v842_v23  ;;  %v902_v48 = vsub.f32 %v3065_v20, %v898_v56  ;;  %v3074_v56 = vld [vmem:[#allocation71_spill] sm:$0xff]  ;;  %v3078_v23 = vld [vmem:[#allocation58_spill] sm:$0xff]  ;;  %v907_v50 = vpop.permute.xlu1 %906 }
  0xce   : > { %v743_v29 = vmul.f32 %v3067_v62, %v3066_v12  ;;  %v867_v25 = vadd.f32 %v863_v16, %v843_v43  ;;  %v868_v21 = vadd.f32 %v864_v19, %v844_v17  ;;  %v746_v54 = vmul.f32 %v2519_v24, %v2607_v26 }
  0xcf   : > { %v747_v36 = vmul.f32 %v2525_v18, %v2609_v4  ;;  %v3070_v45 = vsub.f32 %v3068_v60, %v3069_v55  ;;  %v3073_v2 = vsub.f32 %v3071_v57, %v3072_v38  ;;  %v903_v42 = vsub.f32 %v3074_v56, %v899_v41  ;;  %v3082_v60 = vld [vmem:[#allocation69_spill] sm:$0xff]  ;;  %v3083_v55 = vld [vmem:[#allocation70_spill] sm:$0xff] }
  0xd0   : > { %v748_v49 = vsub.f32 %v740_v22, %v744_v61  ;;  %v3077_v52 = vsub.f32 %v3075_v47, %v3076_v1  ;;  %v3080_v40 = vsub.f32 %v3078_v23, %v3079_v37  ;;  %v749_v43 = vsub.f32 %v741_v44, %v745_v27  ;;  %v3092_v47 = vld [vmem:[#allocation67_spill] sm:$0xff]  ;;  %v3093_v1 = vld [vmem:[#allocation65_spill] sm:$0xff] }
  0xd1   : > { %v885_v51 = vmul.f32 %v883_v33, %v3070_v45  ;;  %v886_v31 = vmul.f32 %v883_v33, %v3073_v2  ;;  %v750_v17 = vsub.f32 %v742_v8, %v746_v54  ;;  %v904_v16 = vsub.f32 %v3081_v9, %v2591_v14  ;;  %v3084_v8 = vld [vmem:[#allocation60_spill] sm:$0xff]  ;;  %v3089_v54 = vld [vmem:[#allocation11_spill] sm:$0xff]  ;;  %v3097_v9 = vld [vmem:[#allocation42_spill] sm:$0xff] }
  0xd2   : > { %v887_v63 = vmul.f32 %v883_v33, %v3077_v52  ;;  %v888_v7 = vmul.f32 %v883_v33, %v3080_v40  ;;  %v751_v19 = vsub.f32 %v743_v29, %v747_v36  ;;  %v909_v22 = vmul.f32 %v907_v50, %v901_v10  ;;  %v3085_v14 = vld [vmem:[#allocation72_spill] sm:$0xff]  ;;  %v3087_v29 = vld [vmem:[#allocation9_spill] sm:$0xff] }
  0xd3   : > { %v889_v13 = vadd.f32 %v885_v51, %v865_v5  ;;  %v890_v20 = vadd.f32 %v886_v31, %v866_v34  ;;  %v2644_v61 = vmul.f32 1.2499999, %v748_v49  ;;  %vm364_vm12 = vcmp.ge.f32.partialorder %v3082_v60, 2.2  ;;  %v3090_v31 = vld [vmem:[#allocation62_spill] sm:$0xff]  ;;  %v3091_v49 = vld [vmem:[#allocation63_spill] sm:$0xff] }
  0xd4   : > { %v891_v12 = vadd.f32 %v887_v63, %v867_v25  ;;  %v892_v41 = vadd.f32 %v888_v7, %v868_v21  ;;  %vm365_vm13 = vcmp.ge.f32.partialorder %v3083_v55, 2.2  ;;  %v910_v45 = vmul.f32 %v907_v50, %v902_v48  ;;  %v3088_v48 = vld [vmem:[#allocation10_spill] sm:$0xff]  ;;  %v3095_v40 = vld [vmem:[#allocation12_spill] sm:$0xff] }
  0xd5   : > { %v911_v33 = vmul.f32 %v907_v50, %v903_v42  ;;  %v2648_v57 = vmul.f32 1.2499999, %v749_v43  ;;  %v2650_v44 = vmul.f32 1.2499999, %v750_v17  ;;  %vm366_vm14 = vcmp.ge.f32.partialorder %v3084_v8, 2.2 }
  0xd6   : > { %vm367_vm15 = vcmp.ge.f32.partialorder %v3085_v14, 2.2  ;;  %v3086_v27 = vmov 0.0   ;;  %v2656_v34 = vmul.f32 1.2499999, %v751_v19  ;;  %v917_v25 = vmul.f32 %v3087_v29, %v2489_v53  ;;  %v3096_v17 = vld [vmem:[#allocation68_spill] sm:$0xff] }
  0xd7   : > { %v1204_v5 = vsel %vm364_vm12, 1.0, %v3086_v27  ;;  %v1205_v10 = vsel %vm365_vm13, 1.0, %v3086_v27  ;;  %v918_v21 = vmul.f32 %v3088_v48, %v2501_v3  ;;  %v919_v36 = vmul.f32 %v3089_v54, %v2503_v39  ;;  %v3098_v19 = vld [vmem:[#allocation61_spill] sm:$0xff] }
  0xd8   : > { %v921_v51 = vmul.f32 %v2481_v15, %v2644_v61  ;;  %v1206_v38 = vsel %vm366_vm14, 1.0, %v3086_v27  ;;  %v1207_v2 = vsel %vm367_vm15, 1.0, %v3086_v27  ;;  %v416_v56 = vsub.f32 %v3090_v31, %v1204_v5  ;;  %v3094_v15 = vld [vmem:[#allocation66_spill] sm:$0xff]  ;;  %v3099_v5 = vld [vmem:[#allocation59_spill] sm:$0xff] }
  0xd9   : > { %v922_v42 = vmul.f32 %v2487_v0, %v2648_v57  ;;  %v923_v53 = vmul.f32 %v2519_v24, %v2650_v44  ;;  %v417_v3 = vsub.f32 %v3091_v49, %v1205_v10  ;;  %v612_v39 = vmul.f32 %v2350_v32, %v3092_v47  ;;  %v3100_v47 = vld [vmem:[#allocation49_spill] sm:$0xff] }
  0xda   : > { %v418_v52 = vsub.f32 %v3093_v1, %v1206_v38  ;;  %v419_v63 = vsub.f32 %v3094_v15, %v1207_v2  ;;  %v1252_v23 = vadd.f32 -2.2, %v3082_v60  ;;  %v1253_v37 = vadd.f32 -2.2, %v3083_v55  ;;  %v3101_v15 = vld [vmem:[#allocation50_spill] sm:$0xff] }
  0xdb   : > { %v920_v7 = vmul.f32 %v3095_v40, %v2505_v46  ;;  %v924_v0 = vmul.f32 %v2525_v18, %v2656_v34  ;;  %v1254_v24 = vadd.f32 -2.2, %v3084_v8  ;;  %v1255_v43 = vadd.f32 -2.2, %v3085_v14 }
  0xdc   : > { %v613_v32 = vmul.f32 %v2353_v30, %v3096_v17  ;;  %v614_v27 = vmul.f32 %v3098_v19, %v3097_v9  ;;  %v615_v60 = vmul.f32 %v2359_v58, %v3099_v5  ;;  %v616_v55 = vmul.f32 %v1252_v23, %v416_v56  ;;  %v931_v56 = vpop.permute.xlu0 %930 }
  0xdd   : > { %v912_v10 = vmul.f32 %v907_v50, %v904_v16  ;;  %v617_v29 = vmul.f32 %v1253_v37, %v417_v3  ;;  %v618_v46 = vmul.f32 %v1254_v24, %v418_v52  ;;  %v619_v48 = vmul.f32 %v1255_v43, %v419_v63  ;;  %v3102_v50 = vld [vmem:[#allocation51_spill] sm:$0xff] }
  0xde   : > { %v925_v54 = vsub.f32 %v917_v25, %v921_v51  ;;  %v926_v18 = vsub.f32 %v918_v21, %v922_v42  ;;  %v927_v38 = vsub.f32 %v919_v36, %v923_v53  ;;  %v620_v8 = vsub.f32 %v612_v39, %v616_v55  ;;  %v3103_v36 = vld [vmem:[#allocation52_spill] sm:$0xff] }
  0xdf   : > { %v928_v2 = vsub.f32 %v920_v7, %v924_v0  ;;  %v621_v14 = vsub.f32 %v613_v32, %v617_v29  ;;  %v622_v31 = vsub.f32 %v614_v27, %v618_v46  ;;  %v623_v49 = vsub.f32 %v615_v60, %v619_v48  ;;  %v955_v60 = vpop.permute.xlu1 %954 }
  0xe0   : > { %v624_v30 = vmul.f32 2.4999995, %v620_v8  ;;  %v756_v1 = vmul.f32 %v3100_v47, %v2581_v59  ;;  %v757_v58 = vmul.f32 %v3101_v15, %v2593_v11  ;;  %v758_v16 = vmul.f32 %v3102_v50, %v2607_v26 }
  0xe1   : > { %v625_v3 = vmul.f32 2.4999995, %v621_v14  ;;  %v626_v25 = vmul.f32 2.4999995, %v622_v31  ;;  %v627_v21 = vmul.f32 2.4999995, %v623_v49  ;;  %v759_v51 = vmul.f32 %v3103_v36, %v2609_v4 }
  0xe2   : > { %v913_v42 = vadd.f32 %v909_v22, %v889_v13  ;;  %v914_v53 = vadd.f32 %v910_v45, %v890_v20  ;;  %v915_v39 = vadd.f32 %v911_v33, %v891_v12  ;;  %v760_v52 = vmul.f32 %v1252_v23, %v624_v30 }
  0xe3   : > { %v916_v63 = vadd.f32 %v912_v10, %v892_v41  ;;  %v761_v40 = vmul.f32 %v1253_v37, %v625_v3  ;;  %v762_v59 = vmul.f32 %v1254_v24, %v626_v25  ;;  %v763_v7 = vmul.f32 %v1255_v43, %v627_v21 }
  0xe4   : > { %v933_v0 = vmul.f32 %v931_v56, %v925_v54  ;;  %v934_v11 = vmul.f32 %v931_v56, %v926_v18  ;;  %v935_v17 = vmul.f32 %v931_v56, %v927_v38  ;;  %v764_v32 = vsub.f32 %v756_v1, %v760_v52 }
  0xe5   : > { %v936_v26 = vmul.f32 %v931_v56, %v928_v2  ;;  %v765_v9 = vsub.f32 %v757_v58, %v761_v40  ;;  %v766_v19 = vsub.f32 %v758_v16, %v762_v59  ;;  %v767_v27 = vsub.f32 %v759_v51, %v763_v7 }
  0xe6   : > { %v768_v5 = vmul.f32 1.2499999, %v764_v32  ;;  %v941_v4 = vmul.f32 %v2146_v6, %v2644_v61  ;;  %v942_v13 = vmul.f32 %v2149_v35, %v2648_v57  ;;  %v943_v20 = vmul.f32 %v2152_v28, %v2650_v44 }
  0xe7   : > { %v769_v12 = vmul.f32 1.2499999, %v765_v9  ;;  %v770_v41 = vmul.f32 1.2499999, %v766_v19  ;;  %v771_v22 = vmul.f32 1.2499999, %v767_v27  ;;  %v944_v45 = vmul.f32 %v3067_v62, %v2656_v34 }
  0xe8   : > { %v945_v33 = vmul.f32 %v1252_v23, %v768_v5  ;;  %v937_v46 = vadd.f32 %v933_v0, %v913_v42  ;;  %v938_v48 = vadd.f32 %v934_v11, %v914_v53  ;;  %v939_v6 = vadd.f32 %v935_v17, %v915_v39 }
  0xe9   : > { %v946_v55 = vmul.f32 %v1253_v37, %v769_v12  ;;  %v947_v10 = vmul.f32 %v1254_v24, %v770_v41  ;;  %v948_v29 = vmul.f32 %v1255_v43, %v771_v22  ;;  %v940_v54 = vadd.f32 %v936_v26, %v916_v63 }
  0xea   : > { %v949_v61 = vsub.f32 %v941_v4, %v945_v33  ;;  %v1048_v41 = vlaneseq }
  0xeb   : > { %v950_v35 = vsub.f32 %v942_v13, %v946_v55  ;;  %v951_v57 = vsub.f32 %v943_v20, %v947_v10  ;;  %v952_v18 = vsub.f32 %v944_v45, %v948_v29  ;;  %v1456_v20 = vmov 1983009808  }
  0xec   : > { %v957_v28 = vmul.f32 %v955_v60, %v949_v61  ;;  %v1046_v12 = vunpack.c.l.s4 %v1456_v20 }
  0xed   : > { %v958_v44 = vmul.f32 %v955_v60, %v950_v35  ;;  %v959_v38 = vmul.f32 %v955_v60, %v951_v57  ;;  %v960_v8 = vmul.f32 %v955_v60, %v952_v18  ;;  %v1049_v57 = vshrl.u32 %v1048_v41, 7 }
  0xee   : > { %v961_v2 = vadd.f32 %v957_v28, %v937_v46  ;;  %v1047_v35 = vunpack.c.0.s8 %v1046_v12 }
  0xef   : > { %v962_v62 = vadd.f32 %v958_v44, %v938_v48  ;;  %v963_v34 = vadd.f32 %v959_v38, %v939_v6  ;;  %v964_v23 = vadd.f32 %v960_v8, %v940_v54 }
  0xf0   : > { %v966_v37 = vsel %vm965_vm0, %v961_v2, 0.0  ;;  %v998_v24 = vrot.slane %v961_v2, 4 }
  0xf1   : > { %v967_v43 = vrot.slane %v966_v37, 4  ;;  %v973_v14 = vsel %vm965_vm0, %v962_v62, 0.0  ;;  %v980_v31 = vsel %vm965_vm0, %v963_v34, 0.0  ;;  %v987_v49 = vsel %vm965_vm0, %v964_v23, 0.0 }
  0xf2   : > { %v974_v30 = vrot.slane %v973_v14, 4  ;;  %v981_v47 = vrot.slane %v980_v31, 4  ;;  %v988_v1 = vrot.slane %v987_v49, 4  ;;  %v999_v15 = vrot.slane %v962_v62, 4 }
  0xf3   : > { %v968_v58 = vadd.f32 %v967_v43, %v966_v37  ;;  %v1000_v50 = vrot.slane %v963_v34, 4  ;;  %v1001_v16 = vrot.slane %v964_v23, 4  ;;  %v1006_v56 = vsel %vm965_vm0, %v998_v24, 0.0 }
  0xf4   : > { %v975_v3 = vadd.f32 %v974_v30, %v973_v14  ;;  %v982_v25 = vadd.f32 %v981_v47, %v980_v31  ;;  %v989_v21 = vadd.f32 %v988_v1, %v987_v49  ;;  %v1007_v36 = vrot.slane %v1006_v56, 4 }
  0xf5   : > { %v969_v51 = vrot.slane %v968_v58, 2  ;;  %v1013_v42 = vsel %vm965_vm0, %v999_v15, 0.0  ;;  %v1020_v53 = vsel %vm965_vm0, %v1000_v50, 0.0  ;;  %v1027_v39 = vsel %vm965_vm0, %v1001_v16, 0.0 }
  0xf6   : > { %v976_v52 = vrot.slane %v975_v3, 2  ;;  %v983_v63 = vrot.slane %v982_v25, 2  ;;  %v990_v40 = vrot.slane %v989_v21, 2  ;;  %v1008_v59 = vadd.f32 %v1007_v36, %v1006_v56 }
  0xf7   : > { %v970_v7 = vadd.f32 %v969_v51, %v968_v58  ;;  %v1014_v0 = vrot.slane %v1013_v42, 4  ;;  %v1021_v11 = vrot.slane %v1020_v53, 4  ;;  %v1028_v17 = vrot.slane %v1027_v39, 4 }
  0xf8   : > { %v977_v32 = vadd.f32 %v976_v52, %v975_v3  ;;  %v984_v26 = vadd.f32 %v983_v63, %v982_v25  ;;  %v991_v9 = vadd.f32 %v990_v40, %v989_v21  ;;  %v1009_v19 = vrot.slane %v1008_v59, 2 }
  0xf9   : > { %v1015_v27 = vadd.f32 %v1014_v0, %v1013_v42  ;;  %v1022_v5 = vadd.f32 %v1021_v11, %v1020_v53  ;;  %v1029_v4 = vadd.f32 %v1028_v17, %v1027_v39  ;;  %v971_v22 = vrot.slane %v970_v7, 1 }
  0xfa   : > { %v1010_v13 = vadd.f32 %v1009_v19, %v1008_v59  ;;  %v978_v55 = vrot.slane %v977_v32, 1  ;;  %v985_v10 = vrot.slane %v984_v26, 1  ;;  %v992_v29 = vrot.slane %v991_v9, 1 }
  0xfb   : > { %v1016_v45 = vrot.slane %v1015_v27, 2  ;;  %v1023_v33 = vrot.slane %v1022_v5, 2  ;;  %v1030_v60 = vrot.slane %v1029_v4, 2  ;;  %v972_v18 = vadd.f32 %v971_v22, %v970_v7 }
  0xfc   : > { %v1011_v46 = vrot.slane %v1010_v13, 1  ;;  %v979_v8 = vadd.f32 %v978_v55, %v977_v32  ;;  %v986_v2 = vadd.f32 %v985_v10, %v984_v26  ;;  %v993_v62 = vadd.f32 %v992_v29, %v991_v9 }
  0xfd   : > { %v1017_v48 = vadd.f32 %v1016_v45, %v1015_v27  ;;  %v1024_v6 = vadd.f32 %v1023_v33, %v1022_v5  ;;  %v1031_v61 = vadd.f32 %v1030_v60, %v1029_v4  ;;  %v1050_v43 = vsub.s32 %v1047_v35, %v1049_v57 }
  0xfe   : > { %v1012_v54 = vadd.f32 %v1011_v46, %v1010_v13 }
  0xff   : > { %v1018_v28 = vrot.slane %v1017_v48, 1  ;;  %v1025_v44 = vrot.slane %v1024_v6, 1  ;;  %v1032_v38 = vrot.slane %v1031_v61, 1 }
 0x100   : > { %v1035_v24 = vsel %vm1034_vm1, %v972_v18, %v1012_v54 }
 0x101   : > { %v1019_v34 = vadd.f32 %v1018_v28, %v1017_v48  ;;  %v1026_v23 = vadd.f32 %v1025_v44, %v1024_v6  ;;  %v1033_v37 = vadd.f32 %v1032_v38, %v1031_v61 }
 0x103   : > { %v1036_v14 = vsel %vm1034_vm1, %v979_v8, %v1019_v34  ;;  %v1037_v31 = vsel %vm1034_vm1, %v986_v2, %v1026_v23  ;;  %v1038_v49 = vsel %vm1034_vm1, %v993_v62, %v1033_v37 }
 0x104   : > { %v1043_v30 = vcombine.low %v1035_v24, %v1036_v14  ;;  %v1044_v47 = vcombine.low %v1037_v31, %v1038_v49 }
 0x106   : > { %v1051_v1 = vrot.slane %v1043_v30, %v1050_v43  ;;  %v1058_v15 = vrot.slane %v1044_v47, %v1050_v43 }
 0x108   : > { %v1059_v58 = vcombine.low %v1051_v1, %v1058_v15 }
 0x10a   : > { %1061 = vst [vmem:[%s186_s11] sm:$0xff] %v1059_v58 }
 0x10b   : > { %1391 = shalt.err (!%p1388_p4)
}
 0x10c   : > { %s1392_s29 = scalar_lea.hbm %s2725_s22, 128  ;;  %s1396_s4 = scalar_lea.hbm %s2772_s3, 256 }
 0x10d   : > { %p1393_p5 = scmp.ne.s32.totalorder %s2725_s22, %s1392_s29  ;;  %p1397_p0 = scmp.lt.u32.totalorder %s2725_s22, %s2772_s3 }
 0x10e   : > { %p1398_p1 = scmp.lt.u32.totalorder %s1396_s4, %s1392_s29  ;;  %p1400_p6 = scmp.lt.u32.totalorder %s1392_s29, %s2725_s22 }
 0x10f   : > { %p1394_p8 = pnand %p1393_p5, %p3104_p11 }
 0x110   : > { %p1399_p3 = por %p1398_p1, %p1397_p0 }
 0x111   : > { %p1395_p9 = pneg %p1394_p8 }
 0x112   : > { %p1401_p12 = por %p1400_p6, %p1399_p3 }
 0x114   : > { %p1402_p13 = pnand %p1401_p12, %p1395_p9 }
 0x116   : > { %1405 = shalt.err (!%p1402_p13)
}
 0x117   : > { %1265 = dma.vmem_to_hbm [thread:$0]  (%p3104_p11), %s2727_s17, 128, %s2725_s22, %s1063_s26  }
 0x118 PF: > { %s1089_s7 = sand.u32 1, %s1432_s12   ;;  %p3105_p7 = scmp.ne.s32.totalorder %s2880_s25, 0 }
 0x119   : > { %p3106_p10 = scmp.ge.s32.totalorder %s1444_s15, 2  ;;  %s1090_s8 = scalar_lea.sflag [#allocation4], %s1089_s7 }
 0x11b   : > { %p1272_p2 = pnand %p3106_p10, %p3105_p7 }
 0x11d   : > { %1427 = dma.done.wait (!%p1272_p2), %s1090_s8, 128  }
 0x11e   : > { %1429 = vsyncadd (!%p1272_p2), %s1090_s8, 4294967168  ;;  %p16_p4 = scmp.ge.s32.totalorder %s1503_s18, 4   ;;  %s3107_s12 = smov %s1436_s13 }
 0x11f   : > { %s3108_s13 = smov %s1440_s14  ;;  %s3109_s14 = smov %s1515_s21 }
 0x120   : > { %s3110_s15 = smov %s1503_s18  ;;  %18 = sbr.rel (!%p16_p4) target bundleno = 5 (0x5), region = 77 }
 0x127   :  { %1095 = vsyncpa [#allocation3], 1 }
 0x128   :  { %1097 = vsyncpa [#allocation3 + $0x1], 1 }
 0x129   :  { %1098 = vsyncpa [#allocation4], 1 }
 0x12a   :  { %1100 = vsyncpa [#allocation4 + $0x1], 1 }

</bundles_post_ra>
